<compile_context>
chip_gen: v7x
topology: tpu7x:2x2x1
jax: 0.10.0
libtpu: 0.0.40
codegen_flags: <defaults>
</compile_context>

<pallas_src>
import functools

import jax
import jax.numpy as jnp
from jax.experimental import pallas as pl
from jax.experimental.pallas import tpu as pltpu


# ----------------------------- synthetic cfg --------------------------------
class cfg:
    NUM_CLASSES = 3
    POOLING_LENGTH = 1      # temporal bins of _RoITemporalPooling
    POOLING_HEIGHT = 4
    POOLING_WIDTH = 4
    DEDUP_TWINS = False
    POOLING_MODE = "pool"
    USE_ATTENTION = False   # RCNN_attention branch disabled


SHOT = 2                    # self.shot
CIN = 3                     # video input channels
DOUT_BASE = 128             # dout_base_model (lane-dense; real R-C3D uses 512)
HEAD_DIM = 128              # _head_to_tail hidden size
ROIS_PER_VIDEO = 4
K_RAW = 3 * 3 * 3 * CIN     # im2col contraction dim (27 taps x 3 channels = 81)
K_PAD = 128                 # zero-padded contraction dim (full MXU / lane width)


def _round_up(x, m):
    return ((x + m - 1) // m) * m


# ----------------------------- Pallas kernels -------------------------------
def _matmul_bias_kernel(x_ref, w_ref, b_ref, o_ref, *, relu):
    # bf16 MXU operands, f32 accumulate; bias-add / ReLU in f32.
    acc = jnp.dot(x_ref[...], w_ref[...], preferred_element_type=jnp.float32)
    acc = acc + b_ref[...]
    if relu:
        acc = jnp.maximum(acc, 0.0)
    o_ref[...] = acc.astype(o_ref.dtype)


def linear(x, w, b, relu=False, tm_max=512):
    """(M, K) @ (K, N) + b (+ReLU), tiled over M with a 'parallel' grid.

    K and N must be multiples of 128 (they are: K_PAD / DOUT_BASE).  TM ~512 keeps the
    per-step working set tiny even on v7x's 64 MiB VMEM while amortizing launch cost.
    """
    M, K = x.shape
    N = w.shape[1]
    TM = min(tm_max, _round_up(M, 8))
    Mp = _round_up(M, TM)
    if Mp != M:
        x = jnp.pad(x, ((0, Mp - M), (0, 0)))
    out = pl.pallas_call(
        functools.partial(_matmul_bias_kernel, relu=relu),
        out_shape=jax.ShapeDtypeStruct((Mp, N), jnp.float32),
        grid_spec=pltpu.PrefetchScalarGridSpec(
            num_scalar_prefetch=0,
            grid=(Mp // TM,),
            in_specs=[pl.BlockSpec((TM, K), lambda i: (i, 0)),
                      pl.BlockSpec((K, N), lambda i: (0, 0)),
                      pl.BlockSpec((1, N), lambda i: (0, 0))],
            out_specs=pl.BlockSpec((TM, N), lambda i: (i, 0)),
        ),
        compiler_params=pltpu.CompilerParams(
            dimension_semantics=("parallel",),
            vmem_limit_bytes=32 * 1024 * 1024),
    )(x, w, b.reshape(1, N))
    return out[:M] if Mp != M else out


def _roi_pool_query_kernel(rb_ref, rs_ref, re_ref, feat_ref, out_ref):
    # feat_ref: (Lf, H, W, C) block of the roi's batch element (batch dim squeezed).
    # Fuses _RoITemporalPooling (POOLING_LENGTH == 1 temporal max over [start, end])
    # with cosine_pool's full-extent spatial mean -> lane-dense (1, C) output.
    r = pl.program_id(0)
    start = rs_ref[r]
    end = re_ref[r]
    feat = feat_ref[...]                                            # (Lf, H, W, C)
    t = jax.lax.broadcasted_iota(jnp.int32, (feat.shape[0], 1, 1, 1), 0)
    masked = jnp.where((t >= start) & (t <= end), feat, -1e30)
    pooled = jnp.max(masked, axis=0)                                # (H, W, C)
    pooled = jnp.where(pooled <= -1e29, 0.0, pooled)                # empty ROI -> 0
    out_ref[...] = jnp.mean(pooled, axis=(0, 1))[None, :]           # (1, C)


def roi_pool_query(base_feat, roi_batch, roi_start, roi_end):
    """Fused _RoITemporalPooling (POOLING_LENGTH=1) + cosine_pool -> (n_roi, C)."""
    B, Lf, H, W, C = base_feat.shape
    n_roi = roi_batch.shape[0]
    grid_spec = pltpu.PrefetchScalarGridSpec(
        num_scalar_prefetch=3,
        grid=(n_roi,),
        in_specs=[pl.BlockSpec((pl.Squeezed(), Lf, H, W, C),
                               lambda r, rb, rs, re: (rb[r], 0, 0, 0, 0))],
        out_specs=pl.BlockSpec((pl.Squeezed(), 1, C),
                               lambda r, rb, rs, re: (r, 0, 0)),
    )
    out = pl.pallas_call(
        _roi_pool_query_kernel,
        out_shape=jax.ShapeDtypeStruct((n_roi, 1, C), jnp.float32),
        grid_spec=grid_spec,
        compiler_params=pltpu.CompilerParams(dimension_semantics=("parallel",)),
    )(roi_batch, roi_start, roi_end, base_feat)
    return out.reshape(n_roi, C)


def _tail_kernel(q_ref, s_ref, hw_ref, hb_ref, cw_ref, cb_ref, tw_ref, tb_ref,
                 cls_ref, twin_ref):
    """Fused tail: support_pool mean + fusion_modules + _head_to_tail +
    RCNN_cls_score(+softmax) + RCNN_twin_pred in a single launch."""
    q = q_ref[...]                                                  # (R, C) f32
    s = jnp.mean(s_ref[...], axis=1)                                # support_pool -> (S, C)

    # TODO(synk): the reference `fusion_modules(in_channels=512, shot)` implementation is
    # not included in the module source; a parameter-free cosine-attention fusion is used.
    qn = q * jax.lax.rsqrt(jnp.sum(q * q, axis=-1, keepdims=True) + 1e-8)
    sn = s * jax.lax.rsqrt(jnp.sum(s * s, axis=-1, keepdims=True) + 1e-8)
    sim = jax.lax.dot_general(qn, sn, (((1,), (1,)), ((), ())),
                              preferred_element_type=jnp.float32)   # (R, S)
    m = jnp.max(sim, axis=-1, keepdims=True)
    e = jnp.exp(sim - m)
    attn = e / jnp.sum(e, axis=-1, keepdims=True)
    agg = jnp.dot(attn, s, preferred_element_type=jnp.float32)      # (R, C)
    fusion = jnp.concatenate([q, agg], axis=-1)                     # (R, 2C)

    # _head_to_tail: Linear + ReLU (bf16 MXU operands, f32 epilogue)
    h = jnp.dot(fusion.astype(jnp.bfloat16), hw_ref[...],
                preferred_element_type=jnp.float32)
    h = jnp.maximum(h + hb_ref[...], 0.0)                           # (R, HEAD_DIM)

    # RCNN_cls_score + F.softmax(dim=1)
    cls = jnp.dot(h, cw_ref[...], preferred_element_type=jnp.float32) + cb_ref[...]
    cm = jnp.max(cls, axis=-1, keepdims=True)
    ce = jnp.exp(cls - cm)
    cls_ref[...] = ce / jnp.sum(ce, axis=-1, keepdims=True)

    # RCNN_twin_pred
    twin_ref[...] = jnp.dot(h, tw_ref[...],
                            preferred_element_type=jnp.float32) + tb_ref[...]


def fused_tail(params, query_feature, support_spatial):
    R = query_feature.shape[0]
    return pl.pallas_call(
        _tail_kernel,
        out_shape=(jax.ShapeDtypeStruct((R, cfg.NUM_CLASSES), jnp.float32),
                   jax.ShapeDtypeStruct((R, 2 * cfg.NUM_CLASSES), jnp.float32)),
        in_specs=[pl.BlockSpec(memory_space=pltpu.MemorySpace.VMEM)] * 8,
        out_specs=(pl.BlockSpec(memory_space=pltpu.MemorySpace.VMEM),
                   pl.BlockSpec(memory_space=pltpu.MemorySpace.VMEM)),
    )(query_feature, support_spatial,
      params["head_w"].astype(jnp.bfloat16), params["head_b"].reshape(1, -1),
      params["cls_w"], params["cls_b"].reshape(1, -1),
      params["twin_w"], params["twin_b"].reshape(1, -1))


# ----------------------------- glue (plain JAX) ------------------------------
def im2col_3d(x, ksize=(3, 3, 3), stride=(1, 4, 4), pad=(1, 1, 1), k_pad=K_PAD):
    """x: (N, L, H, W, C) -> (N*Lo*Ho*Wo, k_pad) patches (offset-major, channel-minor,
    contraction dim zero-padded to k_pad)."""
    # TODO(synk): for production video sizes the im2col should be fused into the conv
    # kernel (build patch tiles in VMEM) to avoid the 27x-inflated HBM round-trip; at
    # these synthetic sizes XLA keeps it fused with the pad/cast and it is negligible.
    N, L, H, W, C = x.shape
    kl, kh, kw = ksize
    sl, sh, sw = stride
    xp = jnp.pad(x, ((0, 0), (pad[0], pad[0]), (pad[1], pad[1]), (pad[2], pad[2]), (0, 0)))
    Lo = (L + 2 * pad[0] - kl) // sl + 1
    Ho = (H + 2 * pad[1] - kh) // sh + 1
    Wo = (W + 2 * pad[2] - kw) // sw + 1
    cols = []
    for dl in range(kl):
        for dh in range(kh):
            for dw in range(kw):
                cols.append(xp[:, dl:dl + Lo * sl:sl, dh:dh + Ho * sh:sh, dw:dw + Wo * sw:sw, :])
    patches = jnp.stack(cols, axis=-2)                      # (N, Lo, Ho, Wo, 27, C)
    patches = patches.reshape(N * Lo * Ho * Wo, kl * kh * kw * C)
    kdim = kl * kh * kw * C
    if kdim < k_pad:
        patches = jnp.pad(patches, ((0, 0), (0, k_pad - kdim)))
    return patches, (N, Lo, Ho, Wo)


def init_params(key):
    k1, k2, k3, k4 = jax.random.split(key, 4)
    return {
        # RCNN_base: Conv3d(3 -> DOUT_BASE, kernel 3x3x3, stride (1,4,4), pad 1) + ReLU
        "conv_w": jax.random.normal(k1, (K_RAW, DOUT_BASE), jnp.float32) * 0.01,
        "conv_b": jnp.zeros((DOUT_BASE,), jnp.float32),
        # _head_to_tail: Linear(2*DOUT_BASE -> HEAD_DIM) + ReLU
        "head_w": jax.random.normal(k2, (2 * DOUT_BASE, HEAD_DIM), jnp.float32) * 0.01,
        "head_b": jnp.zeros((HEAD_DIM,), jnp.float32),
        # RCNN_cls_score / RCNN_twin_pred (normal_init std 0.01 / 0.001, zero bias)
        "cls_w": jax.random.normal(k3, (HEAD_DIM, cfg.NUM_CLASSES), jnp.float32) * 0.01,
        "cls_b": jnp.zeros((cfg.NUM_CLASSES,), jnp.float32),
        "twin_w": jax.random.normal(k4, (HEAD_DIM, 2 * cfg.NUM_CLASSES), jnp.float32) * 0.001,
        "twin_b": jnp.zeros((2 * cfg.NUM_CLASSES,), jnp.float32),
    }


def rcnn_base(conv_w_bf16, conv_b, x_ndhwc):
    patches, (N, Lo, Ho, Wo) = im2col_3d(x_ndhwc)
    y = linear(patches.astype(jnp.bfloat16), conv_w_bf16, conv_b, relu=True)
    return y.reshape(N, Lo, Ho, Wo, DOUT_BASE)


def rcnn_rpn(base_feat, gt_twins):
    # TODO(synk): full _RPN (anchor scoring + NMS proposal generation) has no clean Pallas
    # equivalent; deterministic temporal proposals (feature-frame coords) are emitted instead.
    del gt_twins
    B, Lf = base_feat.shape[0], base_feat.shape[1]
    R = ROIS_PER_VIDEO
    step = Lf // R
    starts = jnp.arange(R, dtype=jnp.float32) * step
    ends = starts + (step - 1)
    rois = jnp.stack(
        [jnp.broadcast_to(jnp.arange(B, dtype=jnp.float32)[:, None], (B, R)),
         jnp.broadcast_to(starts[None, :], (B, R)),
         jnp.broadcast_to(ends[None, :], (B, R))],
        axis=-1)                                            # (B, R, 3): [batch, start, end]
    return rois, 0.0, 0.0


def tdcnn_forward(params, video_data, gt_twins, support_data):
    """Inference forward of _TDCNN. video_data / support_data[i] come in PyTorch NCDHW."""
    batch_size = video_data.shape[0]
    video = jnp.transpose(video_data, (0, 2, 3, 4, 1))      # -> (B, L, H, W, C)

    # conv weight: pad K 81 -> 128 and cast to bf16 once, reused for both conv calls.
    conv_w = jnp.pad(params["conv_w"], ((0, K_PAD - K_RAW), (0, 0))).astype(jnp.bfloat16)
    conv_b = params["conv_b"]

    base_feat = rcnn_base(conv_w, conv_b, video)            # (B, Lf, 4, 4, DOUT_BASE)
    rois, _rpn_loss_cls, _rpn_loss_twin = rcnn_rpn(base_feat, gt_twins)

    # cfg.POOLING_MODE == 'pool' -> RCNN_roi_temporal_pool(base_feat, rois.view(-1, 3))
    # (cosine_pool spatial mean fused into the same kernel; USE_ATTENTION == False)
    rois_flat = rois.reshape(-1, 3)
    roi_b = rois_flat[:, 0].astype(jnp.int32)
    roi_s = jnp.round(rois_flat[:, 1]).astype(jnp.int32)
    roi_e = jnp.round(rois_flat[:, 2]).astype(jnp.int32)
    query_feature = roi_pool_query(base_feat, roi_b, roi_s, roi_e)   # (N_roi, C)

    # support branch: all SHOT clips batched through one RCNN_base call;
    # support_pool (mean over 7x7) happens inside the fused tail kernel.
    support = jnp.concatenate(
        [jnp.transpose(s, (0, 2, 3, 4, 1)) for s in support_data], axis=0)  # (SHOT, Ls, 28, 28, C)
    sfeat = rcnn_base(conv_w, conv_b, support)              # (SHOT, Ls, 7, 7, C)
    S, Ls, Hs, Ws, C = sfeat.shape
    support_spatial = sfeat.reshape(S * Ls, Hs * Ws, C)     # == cat over shots, (S*Ls, 49, C)

    # fused: support mean + fusion_modules + _head_to_tail + cls(+softmax) + twin
    cls_prob, twin_pred = fused_tail(params, query_feature, support_spatial)

    # TODO(synk): training-only path (proposal-target sampling, twin gather, CE / smooth-L1
    # losses) is not implemented; this follows the eval branch of the reference forward.
    R = rois.shape[1]
    cls_prob = cls_prob.reshape(batch_size, R, -1)
    twin_pred = twin_pred.reshape(batch_size, R, -1)
    return rois, cls_prob, twin_pred


# ----------------------------------- main ------------------------------------
if __name__ == "__main__":
    key = jax.random.PRNGKey(0)
    kp, kv, kg, ks = jax.random.split(key, 4)
    params = init_params(kp)

    B, Cin, L, H, W = 2, CIN, 8, 16, 16
    video_data = jax.random.normal(kv, (B, Cin, L, H, W), jnp.float32)       # NCDHW
    gt_twins = jax.random.normal(kg, (B, ROIS_PER_VIDEO, 3), jnp.float32)
    skeys = jax.random.split(ks, SHOT)
    # support clips: spatial 28x28 so RCNN_base yields 7x7 -> support_pool (1,7,7) -> 1x1
    support_data = [jax.random.normal(skeys[i], (1, Cin, 4, 28, 28), jnp.float32)
                    for i in range(SHOT)]

    rois, cls_prob, twin_pred = jax.jit(tdcnn_forward)(params, video_data, gt_twins, support_data)
    jax.block_until_ready((rois, cls_prob, twin_pred))

    assert rois.shape == (B, ROIS_PER_VIDEO, 3)
    assert cls_prob.shape == (B, ROIS_PER_VIDEO, cfg.NUM_CLASSES)
    assert twin_pred.shape == (B, ROIS_PER_VIDEO, 2 * cfg.NUM_CLASSES)
    assert bool(jnp.all(jnp.isfinite(cls_prob))) and bool(jnp.all(jnp.isfinite(twin_pred)))
    print("KERNEL_OK")
</pallas_src>

<mosaic_0001>
module attributes {stable_mosaic.version = 11 : i64} {
  func.func @_matmul_bias_kernel(%arg0: i32, %arg1: memref<392x128xbf16, #tpu.memory_space<vmem>>, %arg2: memref<128x128xbf16, #tpu.memory_space<vmem>>, %arg3: memref<1x128xf32, #tpu.memory_space<vmem>>, %arg4: memref<392x128xf32, #tpu.memory_space<vmem>>) attributes {dimension_semantics = [#tpu.dimension_semantics<parallel>], iteration_bounds = array<i64: 1>, scalar_prefetch = 0 : i64, scratch_operands = 0 : i64, tpu.core_type = #tpu.core_type<tc>, window_params = [{transform_indices = @transform_0, window_bounds = array<i64: 392, 128>}, {pipeline_mode = #tpu.pipeline_mode<synchronous>, transform_indices = @transform_1, window_bounds = array<i64: 128, 128>}, {pipeline_mode = #tpu.pipeline_mode<synchronous>, transform_indices = @transform_2, window_bounds = array<i64: 1, 128>}, {transform_indices = @transform_3, window_bounds = array<i64: 392, 128>}]} {
    %c0 = arith.constant 0 : index
    %c0_0 = arith.constant 0 : index
    %0 = vector.load %arg1[%c0, %c0_0] : memref<392x128xbf16, #tpu.memory_space<vmem>>, vector<392x128xbf16>
    %c0_1 = arith.constant 0 : index
    %c0_2 = arith.constant 0 : index
    %1 = vector.load %arg2[%c0_1, %c0_2] : memref<128x128xbf16, #tpu.memory_space<vmem>>, vector<128x128xbf16>
    %cst = arith.constant dense<0.000000e+00> : vector<392x128xf32>
    %2 = tpu.matmul %0, %1, %cst {dimension_numbers = #tpu.dot_dimension_numbers<[1], [0], [0], [1], [0, 0, 1, 1], [], []>} : vector<392x128xbf16>, vector<128x128xbf16>, vector<392x128xf32> -> vector<392x128xf32>
    %c0_3 = arith.constant 0 : index
    %c0_4 = arith.constant 0 : index
    %3 = vector.load %arg3[%c0_3, %c0_4] : memref<1x128xf32, #tpu.memory_space<vmem>>, vector<1x128xf32>
    %4 = vector.broadcast %3 : vector<1x128xf32> to vector<392x128xf32>
    %5 = arith.addf %2, %4 : vector<392x128xf32>
    %cst_5 = arith.constant 0.000000e+00 : f32
    %6 = vector.broadcast %cst_5 : f32 to vector<392x128xf32>
    %7 = arith.maximumf %5, %6 : vector<392x128xf32>
    %c0_6 = arith.constant 0 : index
    %c0_7 = arith.constant 0 : index
    %8 = vector.load %arg4[%c0_6, %c0_7] : memref<392x128xf32, #tpu.memory_space<vmem>>, vector<392x128xf32>
    tpu.vector_store %arg4[%c0_6, %c0_7], %7 {strides = array<i32>} : memref<392x128xf32, #tpu.memory_space<vmem>>, vector<392x128xf32>,
    return
  }
  func.func @transform_0(%arg0: i32) -> (i32, i32) {
    %c0_i32 = arith.constant 0 : i32
    %c0_i32_0 = arith.constant 0 : i32
    return %arg0, %c0_i32 : i32, i32
  }
  func.func @transform_1(%arg0: i32) -> (i32, i32) {
    %c0_i32 = arith.constant 0 : i32
    %c0_i32_0 = arith.constant 0 : i32
    %c0_i32_1 = arith.constant 0 : i32
    return %c0_i32, %c0_i32_0 : i32, i32
  }
  func.func @transform_2(%arg0: i32) -> (i32, i32) {
    %c0_i32 = arith.constant 0 : i32
    %c0_i32_0 = arith.constant 0 : i32
    %c0_i32_1 = arith.constant 0 : i32
    return %c0_i32, %c0_i32_0 : i32, i32
  }
  func.func @transform_3(%arg0: i32) -> (i32, i32) {
    %c0_i32 = arith.constant 0 : i32
    %c0_i32_0 = arith.constant 0 : i32
    return %arg0, %c0_i32 : i32, i32
  }
}

module attributes {stable_mosaic.version = 11 : i64} {
  func.func @_matmul_bias_kernel(%arg0: i32, %arg1: memref<256x128xbf16, #tpu.memory_space<vmem>>, %arg2: memref<128x128xbf16, #tpu.memory_space<vmem>>, %arg3: memref<1x128xf32, #tpu.memory_space<vmem>>, %arg4: memref<256x128xf32, #tpu.memory_space<vmem>>) attributes {dimension_semantics = [#tpu.dimension_semantics<parallel>], iteration_bounds = array<i64: 1>, scalar_prefetch = 0 : i64, scratch_operands = 0 : i64, tpu.core_type = #tpu.core_type<tc>, window_params = [{transform_indices = @transform_0, window_bounds = array<i64: 256, 128>}, {pipeline_mode = #tpu.pipeline_mode<synchronous>, transform_indices = @transform_1, window_bounds = array<i64: 128, 128>}, {pipeline_mode = #tpu.pipeline_mode<synchronous>, transform_indices = @transform_2, window_bounds = array<i64: 1, 128>}, {transform_indices = @transform_3, window_bounds = array<i64: 256, 128>}]} {
    %c0 = arith.constant 0 : index
    %c0_0 = arith.constant 0 : index
    %0 = vector.load %arg1[%c0, %c0_0] : memref<256x128xbf16, #tpu.memory_space<vmem>>, vector<256x128xbf16>
    %c0_1 = arith.constant 0 : index
    %c0_2 = arith.constant 0 : index
    %1 = vector.load %arg2[%c0_1, %c0_2] : memref<128x128xbf16, #tpu.memory_space<vmem>>, vector<128x128xbf16>
    %cst = arith.constant dense<0.000000e+00> : vector<256x128xf32>
    %2 = tpu.matmul %0, %1, %cst {dimension_numbers = #tpu.dot_dimension_numbers<[1], [0], [0], [1], [0, 0, 1, 1], [], []>} : vector<256x128xbf16>, vector<128x128xbf16>, vector<256x128xf32> -> vector<256x128xf32>
    %c0_3 = arith.constant 0 : index
    %c0_4 = arith.constant 0 : index
    %3 = vector.load %arg3[%c0_3, %c0_4] : memref<1x128xf32, #tpu.memory_space<vmem>>, vector<1x128xf32>
    %4 = vector.broadcast %3 : vector<1x128xf32> to vector<256x128xf32>
    %5 = arith.addf %2, %4 : vector<256x128xf32>
    %cst_5 = arith.constant 0.000000e+00 : f32
    %6 = vector.broadcast %cst_5 : f32 to vector<256x128xf32>
    %7 = arith.maximumf %5, %6 : vector<256x128xf32>
    %c0_6 = arith.constant 0 : index
    %c0_7 = arith.constant 0 : index
    %8 = vector.load %arg4[%c0_6, %c0_7] : memref<256x128xf32, #tpu.memory_space<vmem>>, vector<256x128xf32>
    tpu.vector_store %arg4[%c0_6, %c0_7], %7 {strides = array<i32>} : memref<256x128xf32, #tpu.memory_space<vmem>>, vector<256x128xf32>,
    return
  }
  func.func @transform_0(%arg0: i32) -> (i32, i32) {
    %c0_i32 = arith.constant 0 : i32
    %c0_i32_0 = arith.constant 0 : i32
    return %arg0, %c0_i32 : i32, i32
  }
  func.func @transform_1(%arg0: i32) -> (i32, i32) {
    %c0_i32 = arith.constant 0 : i32
    %c0_i32_0 = arith.constant 0 : i32
    %c0_i32_1 = arith.constant 0 : i32
    return %c0_i32, %c0_i32_0 : i32, i32
  }
  func.func @transform_2(%arg0: i32) -> (i32, i32) {
    %c0_i32 = arith.constant 0 : i32
    %c0_i32_0 = arith.constant 0 : i32
    %c0_i32_1 = arith.constant 0 : i32
    return %c0_i32, %c0_i32_0 : i32, i32
  }
  func.func @transform_3(%arg0: i32) -> (i32, i32) {
    %c0_i32 = arith.constant 0 : i32
    %c0_i32_0 = arith.constant 0 : i32
    return %arg0, %c0_i32 : i32, i32
  }
}

module attributes {stable_mosaic.version = 11 : i64} {
  func.func @_roi_pool_query_kernel(%arg0: i32, %arg1: memref<8xi32, #tpu.memory_space<smem>>, %arg2: memref<8xi32, #tpu.memory_space<smem>>, %arg3: memref<8xi32, #tpu.memory_space<smem>>, %arg4: memref<1x8x4x4x128xf32, #tpu.memory_space<vmem>>, %arg5: memref<1x1x128xf32, #tpu.memory_space<vmem>>) attributes {dimension_semantics = [#tpu.dimension_semantics<parallel>], iteration_bounds = array<i64: 8>, scalar_prefetch = 3 : i64, scratch_operands = 0 : i64, tpu.core_type = #tpu.core_type<tc>, window_params = [{transform_indices = @transform_0, window_bounds = array<i64: 1, 8, 4, 4, 128>}, {transform_indices = @transform_1, window_bounds = array<i64: 1, 1, 128>}]} {
    %0 = arith.index_cast %arg0 : i32 to index
    %1 = memref.load %arg2[%0] : memref<8xi32, #tpu.memory_space<smem>>
    %2 = arith.index_cast %arg0 : i32 to index
    %3 = memref.load %arg3[%2] : memref<8xi32, #tpu.memory_space<smem>>
    %c0 = arith.constant 0 : index
    %c0_0 = arith.constant 0 : index
    %c0_1 = arith.constant 0 : index
    %c0_2 = arith.constant 0 : index
    %c0_3 = arith.constant 0 : index
    %4 = vector.load %arg4[%c0, %c0_0, %c0_1, %c0_2, %c0_3] : memref<1x8x4x4x128xf32, #tpu.memory_space<vmem>>, vector<1x8x4x4x128xf32>
    %5 = vector.shape_cast %4 : vector<1x8x4x4x128xf32> to vector<8x4x4x128xf32>
    %6 = tpu.iota {dimensions = array<i32: 0>} : vector<8x1x1x1xi32>
    %7 = vector.broadcast %1 : i32 to vector<8x1x1x1xi32>
    %8 = arith.cmpi sge, %6, %7 : vector<8x1x1x1xi32>
    %9 = vector.broadcast %3 : i32 to vector<8x1x1x1xi32>
    %10 = arith.cmpi sle, %6, %9 : vector<8x1x1x1xi32>
    %11 = arith.andi %8, %10 : vector<8x1x1x1xi1>
    %cst = arith.constant -1.000000e+30 : f32
    %12 = vector.shape_cast %11 : vector<8x1x1x1xi1> to vector<8x1x1x1xi1>
    %13 = vector.broadcast %12 : vector<8x1x1x1xi1> to vector<8x4x4x128xi1>
    %14 = vector.broadcast %cst : f32 to vector<8x4x4x128xf32>
    %15 = arith.select %13, %5, %14 : vector<8x4x4x128xi1>, vector<8x4x4x128xf32>
    %cst_4 = arith.constant dense<0xFF800000> : vector<4x4x128xf32>
    %16 = vector.multi_reduction <maximumf>, %15, %cst_4 [0] : vector<8x4x4x128xf32> to vector<4x4x128xf32>
    %cst_5 = arith.constant -1.000000e+29 : f32
    %17 = vector.broadcast %cst_5 : f32 to vector<4x4x128xf32>
    %18 = arith.cmpf ole, %16, %17 : vector<4x4x128xf32>
    %cst_6 = arith.constant 0.000000e+00 : f32
    %19 = vector.broadcast %cst_6 : f32 to vector<4x4x128xf32>
    %20 = arith.select %18, %19, %16 : vector<4x4x128xi1>, vector<4x4x128xf32>
    %cst_7 = arith.constant dense<0.000000e+00> : vector<128xf32>
    %21 = vector.multi_reduction <add>, %20, %cst_7 [0, 1] : vector<4x4x128xf32> to vector<128xf32>
    %cst_8 = arith.constant 1.600000e+01 : f32
    %22 = vector.broadcast %cst_8 : f32 to vector<128xf32>
    %23 = arith.divf %21, %22 : vector<128xf32>
    %24 = vector.shape_cast %23 : vector<128xf32> to vector<1x128xf32>
    %c0_9 = arith.constant 0 : index
    %c0_10 = arith.constant 0 : index
    %c0_11 = arith.constant 0 : index
    %25 = vector.load %arg5[%c0_9, %c0_10, %c0_11] : memref<1x1x128xf32, #tpu.memory_space<vmem>>, vector<1x1x128xf32>
    %26 = vector.shape_cast %25 : vector<1x1x128xf32> to vector<1x128xf32>
    %27 = vector.shape_cast %24 : vector<1x128xf32> to vector<1x1x128xf32>
    tpu.vector_store %arg5[%c0_9, %c0_10, %c0_11], %27 {strides = array<i32>} : memref<1x1x128xf32, #tpu.memory_space<vmem>>, vector<1x1x128xf32>,
    return
  }
  func.func @transform_0(%arg0: i32, %arg1: memref<8xi32, #tpu.memory_space<smem>>, %arg2: memref<8xi32, #tpu.memory_space<smem>>, %arg3: memref<8xi32, #tpu.memory_space<smem>>) -> (i32, i32, i32, i32, i32) {
    %0 = arith.index_cast %arg0 : i32 to index
    %1 = memref.load %arg1[%0] : memref<8xi32, #tpu.memory_space<smem>>
    %c0_i32 = arith.constant 0 : i32
    %c0_i32_0 = arith.constant 0 : i32
    %c0_i32_1 = arith.constant 0 : i32
    %c0_i32_2 = arith.constant 0 : i32
    %c0_i32_3 = arith.constant 0 : i32
    return %1, %c0_i32, %c0_i32_0, %c0_i32_1, %c0_i32_2 : i32, i32, i32, i32, i32
  }
  func.func @transform_1(%arg0: i32, %arg1: memref<8xi32, #tpu.memory_space<smem>>, %arg2: memref<8xi32, #tpu.memory_space<smem>>, %arg3: memref<8xi32, #tpu.memory_space<smem>>) -> (i32, i32, i32) {
    %c0_i32 = arith.constant 0 : i32
    %c0_i32_0 = arith.constant 0 : i32
    %c0_i32_1 = arith.constant 0 : i32
    return %arg0, %c0_i32, %c0_i32_0 : i32, i32, i32
  }
}

module attributes {stable_mosaic.version = 11 : i64} {
  func.func @_tail_kernel(%arg0: memref<8x128xf32, #tpu.memory_space<vmem>>, %arg1: memref<8x49x128xf32, #tpu.memory_space<vmem>>, %arg2: memref<256x128xbf16, #tpu.memory_space<vmem>>, %arg3: memref<1x128xf32, #tpu.memory_space<vmem>>, %arg4: memref<128x3xf32, #tpu.memory_space<vmem>>, %arg5: memref<1x3xf32, #tpu.memory_space<vmem>>, %arg6: memref<128x6xf32, #tpu.memory_space<vmem>>, %arg7: memref<1x6xf32, #tpu.memory_space<vmem>>, %arg8: memref<8x3xf32, #tpu.memory_space<vmem>>, %arg9: memref<8x6xf32, #tpu.memory_space<vmem>>) attributes {dimension_semantics = [], scalar_prefetch = 0 : i64, scratch_operands = 0 : i64, tpu.core_type = #tpu.core_type<tc>} {
    %c0 = arith.constant 0 : index
    %c0_0 = arith.constant 0 : index
    %0 = vector.load %arg0[%c0, %c0_0] : memref<8x128xf32, #tpu.memory_space<vmem>>, vector<8x128xf32>
    %c0_1 = arith.constant 0 : index
    %c0_2 = arith.constant 0 : index
    %c0_3 = arith.constant 0 : index
    %1 = vector.load %arg1[%c0_1, %c0_2, %c0_3] : memref<8x49x128xf32, #tpu.memory_space<vmem>>, vector<8x49x128xf32>
    %cst = arith.constant dense<0.000000e+00> : vector<8x128xf32>
    %2 = vector.multi_reduction <add>, %1, %cst [1] : vector<8x49x128xf32> to vector<8x128xf32>
    %cst_4 = arith.constant 4.900000e+01 : f32
    %3 = vector.broadcast %cst_4 : f32 to vector<8x128xf32>
    %4 = arith.divf %2, %3 : vector<8x128xf32>
    %5 = arith.mulf %0, %0 : vector<8x128xf32>
    %cst_5 = arith.constant dense<0.000000e+00> : vector<8xf32>
    %6 = vector.multi_reduction <add>, %5, %cst_5 [1] : vector<8x128xf32> to vector<8xf32>
    %7 = vector.shape_cast %6 : vector<8xf32> to vector<8x1xf32>
    %cst_6 = arith.constant 9.99999993E-9 : f32
    %8 = vector.broadcast %cst_6 : f32 to vector<8x1xf32>
    %9 = arith.addf %7, %8 : vector<8x1xf32>
    %10 = math.rsqrt %9 : vector<8x1xf32>
    %11 = vector.broadcast %10 : vector<8x1xf32> to vector<8x128xf32>
    %12 = arith.mulf %0, %11 : vector<8x128xf32>
    %13 = arith.mulf %4, %4 : vector<8x128xf32>
    %cst_7 = arith.constant dense<0.000000e+00> : vector<8xf32>
    %14 = vector.multi_reduction <add>, %13, %cst_7 [1] : vector<8x128xf32> to vector<8xf32>
    %15 = vector.shape_cast %14 : vector<8xf32> to vector<8x1xf32>
    %cst_8 = arith.constant 9.99999993E-9 : f32
    %16 = vector.broadcast %cst_8 : f32 to vector<8x1xf32>
    %17 = arith.addf %15, %16 : vector<8x1xf32>
    %18 = math.rsqrt %17 : vector<8x1xf32>
    %19 = vector.broadcast %18 : vector<8x1xf32> to vector<8x128xf32>
    %20 = arith.mulf %4, %19 : vector<8x128xf32>
    %cst_9 = arith.constant dense<0.000000e+00> : vector<8x8xf32>
    %21 = tpu.matmul %12, %20, %cst_9 {dimension_numbers = #tpu.dot_dimension_numbers<[1], [1], [0], [0], [0, 0, 1, 0], [], []>} : vector<8x128xf32>, vector<8x128xf32>, vector<8x8xf32> -> vector<8x8xf32>
    %cst_10 = arith.constant dense<0xFF800000> : vector<8xf32>
    %22 = vector.multi_reduction <maximumf>, %21, %cst_10 [1] : vector<8x8xf32> to vector<8xf32>
    %23 = vector.shape_cast %22 : vector<8xf32> to vector<8x1xf32>
    %24 = vector.broadcast %23 : vector<8x1xf32> to vector<8x8xf32>
    %25 = arith.subf %21, %24 : vector<8x8xf32>
    %26 = math.exp %25 : vector<8x8xf32>
    %cst_11 = arith.constant dense<0.000000e+00> : vector<8xf32>
    %27 = vector.multi_reduction <add>, %26, %cst_11 [1] : vector<8x8xf32> to vector<8xf32>
    %28 = vector.shape_cast %27 : vector<8xf32> to vector<8x1xf32>
    %29 = vector.broadcast %28 : vector<8x1xf32> to vector<8x8xf32>
    %30 = arith.divf %26, %29 : vector<8x8xf32>
    %cst_12 = arith.constant dense<0.000000e+00> : vector<8x128xf32>
    %31 = tpu.matmul %30, %4, %cst_12 {dimension_numbers = #tpu.dot_dimension_numbers<[1], [0], [0], [1], [0, 0, 1, 1], [], []>} : vector<8x8xf32>, vector<8x128xf32>, vector<8x128xf32> -> vector<8x128xf32>
    %32 = tpu.concatenate %0, %31 in 1 : vector<8x128xf32>, vector<8x128xf32> -> vector<8x256xf32>
    %33 = arith.truncf %32 : vector<8x256xf32> to vector<8x256xbf16>
    %c0_13 = arith.constant 0 : index
    %c0_14 = arith.constant 0 : index
    %34 = vector.load %arg2[%c0_13, %c0_14] : memref<256x128xbf16, #tpu.memory_space<vmem>>, vector<256x128xbf16>
    %cst_15 = arith.constant dense<0.000000e+00> : vector<8x128xf32>
    %35 = tpu.matmul %33, %34, %cst_15 {dimension_numbers = #tpu.dot_dimension_numbers<[1], [0], [0], [1], [0, 0, 1, 1], [], []>} : vector<8x256xbf16>, vector<256x128xbf16>, vector<8x128xf32> -> vector<8x128xf32>
    %c0_16 = arith.constant 0 : index
    %c0_17 = arith.constant 0 : index
    %36 = vector.load %arg3[%c0_16, %c0_17] : memref<1x128xf32, #tpu.memory_space<vmem>>, vector<1x128xf32>
    %37 = vector.broadcast %36 : vector<1x128xf32> to vector<8x128xf32>
    %38 = arith.addf %35, %37 : vector<8x128xf32>
    %cst_18 = arith.constant 0.000000e+00 : f32
    %39 = vector.broadcast %cst_18 : f32 to vector<8x128xf32>
    %40 = arith.maximumf %38, %39 : vector<8x128xf32>
    %c0_19 = arith.constant 0 : index
    %c0_20 = arith.constant 0 : index
    %41 = vector.load %arg4[%c0_19, %c0_20] : memref<128x3xf32, #tpu.memory_space<vmem>>, vector<128x3xf32>
    %cst_21 = arith.constant dense<0.000000e+00> : vector<8x3xf32>
    %42 = tpu.matmul %40, %41, %cst_21 {dimension_numbers = #tpu.dot_dimension_numbers<[1], [0], [0], [1], [0, 0, 1, 1], [], []>} : vector<8x128xf32>, vector<128x3xf32>, vector<8x3xf32> -> vector<8x3xf32>
    %c0_22 = arith.constant 0 : index
    %c0_23 = arith.constant 0 : index
    %43 = vector.load %arg5[%c0_22, %c0_23] : memref<1x3xf32, #tpu.memory_space<vmem>>, vector<1x3xf32>
    %44 = vector.broadcast %43 : vector<1x3xf32> to vector<8x3xf32>
    %45 = arith.addf %42, %44 : vector<8x3xf32>
    %cst_24 = arith.constant dense<0xFF800000> : vector<8xf32>
    %46 = vector.multi_reduction <maximumf>, %45, %cst_24 [1] : vector<8x3xf32> to vector<8xf32>
    %47 = vector.shape_cast %46 : vector<8xf32> to vector<8x1xf32>
    %48 = vector.broadcast %47 : vector<8x1xf32> to vector<8x3xf32>
    %49 = arith.subf %45, %48 : vector<8x3xf32>
    %50 = math.exp %49 : vector<8x3xf32>
    %cst_25 = arith.constant dense<0.000000e+00> : vector<8xf32>
    %51 = vector.multi_reduction <add>, %50, %cst_25 [1] : vector<8x3xf32> to vector<8xf32>
    %52 = vector.shape_cast %51 : vector<8xf32> to vector<8x1xf32>
    %53 = vector.broadcast %52 : vector<8x1xf32> to vector<8x3xf32>
    %54 = arith.divf %50, %53 : vector<8x3xf32>
    %c0_26 = arith.constant 0 : index
    %c0_27 = arith.constant 0 : index
    %55 = vector.load %arg8[%c0_26, %c0_27] : memref<8x3xf32, #tpu.memory_space<vmem>>, vector<8x3xf32>
    tpu.vector_store %arg8[%c0_26, %c0_27], %54 {strides = array<i32>} : memref<8x3xf32, #tpu.memory_space<vmem>>, vector<8x3xf32>,
    %c0_28 = arith.constant 0 : index
    %c0_29 = arith.constant 0 : index
    %56 = vector.load %arg6[%c0_28, %c0_29] : memref<128x6xf32, #tpu.memory_space<vmem>>, vector<128x6xf32>
    %cst_30 = arith.constant dense<0.000000e+00> : vector<8x6xf32>
    %57 = tpu.matmul %40, %56, %cst_30 {dimension_numbers = #tpu.dot_dimension_numbers<[1], [0], [0], [1], [0, 0, 1, 1], [], []>} : vector<8x128xf32>, vector<128x6xf32>, vector<8x6xf32> -> vector<8x6xf32>
    %c0_31 = arith.constant 0 : index
    %c0_32 = arith.constant 0 : index
    %58 = vector.load %arg7[%c0_31, %c0_32] : memref<1x6xf32, #tpu.memory_space<vmem>>, vector<1x6xf32>
    %59 = vector.broadcast %58 : vector<1x6xf32> to vector<8x6xf32>
    %60 = arith.addf %57, %59 : vector<8x6xf32>
    %c0_33 = arith.constant 0 : index
    %c0_34 = arith.constant 0 : index
    %61 = vector.load %arg9[%c0_33, %c0_34] : memref<8x6xf32, #tpu.memory_space<vmem>>, vector<8x6xf32>
    tpu.vector_store %arg9[%c0_33, %c0_34], %60 {strides = array<i32>} : memref<8x6xf32, #tpu.memory_space<vmem>>, vector<8x6xf32>,
    return
  }
}

</mosaic_0001>

<bundles_post_ra>
// kernel: tdcnn_forward.6
= control target key start
LH: loop header
LB: loop body
LE: loop exit
PB: predicated region body
PF: predicated region fallthrough
CT: control target
= control target key end

     0   :  { %v851_v0 = vmov 0.0   ;;  %vm852_vm0 = vmmov 0   ;;  %s1239_s1 = inlined_call_operand.vmem [shape: bf16[128,128], index: 1, kind: input, shape index: {}]   ;;  %s1240_s0 = inlined_call_operand.vmem [shape: bf16[392,128], index: 0, kind: input, shape index: {}]   ;;  %s1241_s2 = inlined_call_operand.vmem [shape: f32[1,128], index: 2, kind: input, shape index: {}]   ;;  %s1242_s3 = inlined_call_operand.vmem [shape: f32[392,128], index: 3, kind: output, shape index: {}]  }
   0x1   :  { %684 = vmatprep.subr.bf16.mxu0 %v851_v0  ;;  %v818_v1 = vld [vmem:[%s1239_s1] sm:$0xff]   ;;  %800 = vmatprep.subr.bf16.mxu1 %v851_v0  ;;  %v819_v2 = vld [vmem:[%s1239_s1 + $0x8] sm:$0xff]   ;;  %v820_v3 = vld [vmem:[%s1239_s1 + $0x10] sm:$0xff]  }
   0x2   :  { %700 = vmatprep.mubr.msk.bf16.mxu0 %vm852_vm0, %v851_v0  ;;  %752 = vmatprep.mubr.msk.bf16.mxu1 %vm852_vm0, %v851_v0  ;;  %v821_v4 = vld [vmem:[%s1239_s1 + $0x18] sm:$0xff]   ;;  %v822_v5 = vld [vmem:[%s1239_s1 + $0x20] sm:$0xff]   ;;  %v823_v6 = vld [vmem:[%s1239_s1 + $0x28] sm:$0xff]  }
   0x3   :  { %685 = vmatpush3.bf16.msra.mxu0 %v818_v1  ;;  %808 = vmatpush3.bf16.msra.mxu1 %v818_v1  ;;  %v824_v7 = vld [vmem:[%s1239_s1 + $0x30] sm:$0xff]   ;;  %v825_v8 = vld [vmem:[%s1239_s1 + $0x38] sm:$0xff]   ;;  %v826_v9 = vld [vmem:[%s1240_s0] sm:$0xff]  }
   0x4   :  { %686 = vmatprep.subr.bf16.mxu0 %v851_v0  ;;  %801 = vmatprep.subr.bf16.mxu1 %v851_v0  ;;  %v827_v10 = vld [vmem:[%s1240_s0 + $0x68] sm:$0xff]   ;;  %v829_v12 = vld [vmem:[%s1240_s0 + $0x70] sm:$0xff]   ;;  %v831_v14 = vld [vmem:[%s1240_s0 + $0x78] sm:$0xff]  }
   0x5   :  { %v828_v11 = vld [vmem:[%s1240_s0 + $0x8] sm:$0xff]   ;;  %v830_v13 = vld [vmem:[%s1240_s0 + $0x10] sm:$0xff]   ;;  %v832_v15 = vld [vmem:[%s1240_s0 + $0x18] sm:$0xff]  }
   0x6   :  { %v833_v16 = vld [vmem:[%s1240_s0 + $0x80] sm:$0xff]   ;;  %v835_v18 = vld [vmem:[%s1240_s0 + $0x88] sm:$0xff]   ;;  %v837_v20 = vld [vmem:[%s1240_s0 + $0x90] sm:$0xff]  }
   0x7   :  { %687 = vmatpush3.bf16.msra.mxu0 %v819_v2  ;;  %809 = vmatpush3.bf16.msra.mxu1 %v819_v2  ;;  %v834_v17 = vld [vmem:[%s1240_s0 + $0x20] sm:$0xff]   ;;  %v836_v19 = vld [vmem:[%s1240_s0 + $0x28] sm:$0xff]   ;;  %v838_v21 = vld [vmem:[%s1240_s0 + $0x30] sm:$0xff]  }
   0x8   :  { %688 = vmatprep.subr.bf16.mxu0 %v851_v0  ;;  %802 = vmatprep.subr.bf16.mxu1 %v851_v0  ;;  %v839_v22 = vld [vmem:[%s1240_s0 + $0x98] sm:$0xff]   ;;  %v841_v24 = vld [vmem:[%s1240_s0 + $0xa0] sm:$0xff]   ;;  %v843_v26 = vld [vmem:[%s1240_s0 + $0xa8] sm:$0xff]  }
   0x9   :  { %v840_v23 = vld [vmem:[%s1240_s0 + $0x38] sm:$0xff]   ;;  %v842_v25 = vld [vmem:[%s1240_s0 + $0x40] sm:$0xff]   ;;  %v844_v27 = vld [vmem:[%s1240_s0 + $0x48] sm:$0xff]  }
   0xa   :  { %v845_v28 = vld [vmem:[%s1240_s0 + $0xb0] sm:$0xff]   ;;  %v847_v30 = vld [vmem:[%s1240_s0 + $0xb8] sm:$0xff]   ;;  %v849_v32 = vld [vmem:[%s1240_s0 + $0xc0] ss:$0 sps:$4 sm:$0xff]  }
   0xb   :  { %689 = vmatpush3.bf16.msra.mxu0 %v820_v3  ;;  %810 = vmatpush3.bf16.msra.mxu1 %v820_v3  ;;  %v846_v29 = vld [vmem:[%s1240_s0 + $0x50] sm:$0xff]   ;;  %v848_v31 = vld [vmem:[%s1240_s0 + $0x58] sm:$0xff]   ;;  %v850_v33 = vld [vmem:[%s1240_s0 + $0x60] sm:$0xff]  }
   0xc   :  { %690 = vmatprep.subr.bf16.mxu0 %v851_v0  ;;  %803 = vmatprep.subr.bf16.mxu1 %v851_v0  ;;  %v1041_v34 = vld [vmem:[%s1241_s2] ss:$0 sm:$0xff] }
   0xf   :  { %691 = vmatpush3.bf16.msra.mxu0 %v821_v4  ;;  %811 = vmatpush3.bf16.msra.mxu1 %v821_v4 }
  0x10   :  { %692 = vmatprep.subr.bf16.mxu0 %v851_v0  ;;  %804 = vmatprep.subr.bf16.mxu1 %v851_v0 }
  0x13   :  { %693 = vmatpush3.bf16.msra.mxu0 %v822_v5  ;;  %812 = vmatpush3.bf16.msra.mxu1 %v822_v5 }
  0x14   :  { %694 = vmatprep.subr.bf16.mxu0 %v851_v0  ;;  %805 = vmatprep.subr.bf16.mxu1 %v851_v0 }
  0x17   :  { %695 = vmatpush3.bf16.msra.mxu0 %v823_v6  ;;  %813 = vmatpush3.bf16.msra.mxu1 %v823_v6 }
  0x18   :  { %696 = vmatprep.subr.bf16.mxu0 %v851_v0  ;;  %806 = vmatprep.subr.bf16.mxu1 %v851_v0 }
  0x1b   :  { %697 = vmatpush3.bf16.msra.mxu0 %v824_v7  ;;  %814 = vmatpush3.bf16.msra.mxu1 %v824_v7 }
  0x1c   :  { %698 = vmatprep.subr.bf16.mxu0 %v851_v0  ;;  %807 = vmatprep.subr.bf16.mxu1 %v851_v0 }
  0x1f   :  { %699 = vmatpush3.bf16.msra.mxu0 %v825_v8  ;;  %815 = vmatpush3.bf16.msra.mxu1 %v825_v8 }
  0x22   :  { %701 = vmatmul.mubr.bf16.vlgmr.msra.gmra.mrb[0].mxu0 %v826_v9  ;;  %753 = vmatmul.mubr.bf16.vlgmr.msra.gmra.mrb[0].mxu1 %v827_v10 }
  0x23   :  { %704 = vmatprep.mubr.msk.bf16.mxu0 %vm852_vm0, %v851_v0  ;;  %756 = vmatprep.mubr.msk.bf16.mxu1 %vm852_vm0, %v851_v0 }
  0x2a   :  { %705 = vmatmul.mubr.bf16.gmra.mrb[4].mxu0 %v828_v11  ;;  %757 = vmatmul.mubr.bf16.gmra.mrb[4].mxu1 %v829_v12 }
  0x2b   :  { %708 = vmatprep.mubr.msk.bf16.mxu0 %vm852_vm0, %v851_v0  ;;  %760 = vmatprep.mubr.msk.bf16.mxu1 %vm852_vm0, %v851_v0 }
  0x32   :  { %709 = vmatmul.mubr.bf16.gmra.mrb[8].mxu0 %v830_v13  ;;  %761 = vmatmul.mubr.bf16.gmra.mrb[8].mxu1 %v831_v14 }
  0x33   :  { %712 = vmatprep.mubr.msk.bf16.mxu0 %vm852_vm0, %v851_v0  ;;  %764 = vmatprep.mubr.msk.bf16.mxu1 %vm852_vm0, %v851_v0 }
  0x3a   :  { %713 = vmatmul.mubr.bf16.gmra.mrb[12].mxu0 %v832_v15  ;;  %765 = vmatmul.mubr.bf16.gmra.mrb[12].mxu1 %v833_v16 }
  0x3b   :  { %716 = vmatprep.mubr.msk.bf16.mxu0 %vm852_vm0, %v851_v0  ;;  %768 = vmatprep.mubr.msk.bf16.mxu1 %vm852_vm0, %v851_v0 }
  0x42   :  { %717 = vmatmul.mubr.bf16.gmra.mrb[16].mxu0 %v834_v17  ;;  %769 = vmatmul.mubr.bf16.gmra.mrb[16].mxu1 %v835_v18 }
  0x43   :  { %720 = vmatprep.mubr.msk.bf16.mxu0 %vm852_vm0, %v851_v0  ;;  %772 = vmatprep.mubr.msk.bf16.mxu1 %vm852_vm0, %v851_v0 }
  0x4a   :  { %721 = vmatmul.mubr.bf16.gmra.mrb[20].mxu0 %v836_v19  ;;  %773 = vmatmul.mubr.bf16.gmra.mrb[20].mxu1 %v837_v20 }
  0x4b   :  { %724 = vmatprep.mubr.msk.bf16.mxu0 %vm852_vm0, %v851_v0  ;;  %776 = vmatprep.mubr.msk.bf16.mxu1 %vm852_vm0, %v851_v0 }
  0x52   :  { %725 = vmatmul.mubr.bf16.gmra.mrb[24].mxu0 %v838_v21  ;;  %777 = vmatmul.mubr.bf16.gmra.mrb[24].mxu1 %v839_v22 }
  0x53   :  { %728 = vmatprep.mubr.msk.bf16.mxu0 %vm852_vm0, %v851_v0  ;;  %780 = vmatprep.mubr.msk.bf16.mxu1 %vm852_vm0, %v851_v0 }
  0x5a   :  { %729 = vmatmul.mubr.bf16.gmra.mrb[28].mxu0 %v840_v23  ;;  %781 = vmatmul.mubr.bf16.gmra.mrb[28].mxu1 %v841_v24 }
  0x5b   :  { %732 = vmatprep.mubr.msk.bf16.mxu0 %vm852_vm0, %v851_v0  ;;  %784 = vmatprep.mubr.msk.bf16.mxu1 %vm852_vm0, %v851_v0 }
  0x62   :  { %733 = vmatmul.mubr.bf16.gmra.mrb[32].mxu0 %v842_v25  ;;  %785 = vmatmul.mubr.bf16.gmra.mrb[32].mxu1 %v843_v26 }
  0x63   :  { %736 = vmatprep.mubr.msk.bf16.mxu0 %vm852_vm0, %v851_v0  ;;  %788 = vmatprep.mubr.msk.bf16.mxu1 %vm852_vm0, %v851_v0 }
  0x6a   :  { %737 = vmatmul.mubr.bf16.gmra.mrb[36].mxu0 %v844_v27  ;;  %789 = vmatmul.mubr.bf16.gmra.mrb[36].mxu1 %v845_v28 }
  0x6b   :  { %740 = vmatprep.mubr.msk.bf16.mxu0 %vm852_vm0, %v851_v0  ;;  %792 = vmatprep.mubr.msk.bf16.mxu1 %vm852_vm0, %v851_v0 }
  0x72   :  { %741 = vmatmul.mubr.bf16.gmra.mrb[40].mxu0 %v846_v29  ;;  %793 = vmatmul.mubr.bf16.gmra.mrb[40].mxu1 %v847_v30 }
  0x73   :  { %744 = vmatprep.mubr.msk.bf16.mxu0 %vm852_vm0, %v851_v0  ;;  %796 = vmatprep.mubr.msk.bf16.mxu1 %vm852_vm0, %v851_v0 }
  0x7a   :  { %745 = vmatmul.mubr.bf16.gmra.mrb[44].mxu0 %v848_v31  ;;  %797 = vmatmul.mubr.bf16.gmra.mrb[44].mxu1 %v849_v32 }
  0x7b   :  { %748 = vmatprep.mubr.msk.bf16.mxu0 %vm852_vm0, %v851_v0 }
  0x82   :  { %749 = vmatmul.mubr.bf16.gmra.mrb[48].mxu0 %v850_v33 }
  0xf5   :  { %v317_v35 = vpop.f32.mrb[0].mxu0  ;;  %v421_v36 = vpop.f32.mrb[0].mxu1 }
  0xf6   :  { %v318_v37 = vadd.f32 %v1041_v34, %v317_v35  ;;  %v702_v38 = vpop.f32.mrb[1].mxu0  ;;  %v422_v39 = vadd.f32 %v1041_v34, %v421_v36  ;;  %v754_v40 = vpop.f32.mrb[1].mxu1 }
  0xf7   :  { %v320_v41 = vpop.f32.mrb[2].mxu0  ;;  %v424_v42 = vpop.f32.mrb[2].mxu1 }
  0xf8   :  { %v515_v43 = vmax.f32 %v318_v37, 0.0  ;;  %v321_v44 = vadd.f32 %v1041_v34, %v320_v41  ;;  %v703_v45 = vpop.f32.mrb[3].mxu0  ;;  %v541_v46 = vmax.f32 %v422_v39, 0.0  ;;  %v425_v47 = vadd.f32 %v1041_v34, %v424_v42  ;;  %v755_v48 = vpop.f32.mrb[3].mxu1 }
  0xfa   :  { %564 = vst [vmem:[%s1242_s3] sm:$0xff] %v515_v43  ;;  %v516_v49 = vmax.f32 %v321_v44, 0.0  ;;  %590 = vst [vmem:[%s1242_s3 + $0xd0] sm:$0xff] %v541_v46  ;;  %v542_v50 = vmax.f32 %v425_v47, 0.0 }
  0xfc   :  { %565 = vst [vmem:[%s1242_s3 + $0x8] sm:$0xff] %v516_v49  ;;  %591 = vst [vmem:[%s1242_s3 + $0xd8] sm:$0xff] %v542_v50 }
  0xfd   :  { %v325_v51 = vpop.f32.mrb[4].mxu0  ;;  %v429_v52 = vpop.f32.mrb[4].mxu1 }
  0xfe   :  { %v326_v53 = vadd.f32 %v1041_v34, %v325_v51  ;;  %v706_v54 = vpop.f32.mrb[5].mxu0  ;;  %v430_v55 = vadd.f32 %v1041_v34, %v429_v52  ;;  %v758_v56 = vpop.f32.mrb[5].mxu1 }
  0xff   :  { %v328_v57 = vpop.f32.mrb[6].mxu0  ;;  %v432_v58 = vpop.f32.mrb[6].mxu1 }
 0x100   :  { %v517_v59 = vmax.f32 %v326_v53, 0.0  ;;  %v329_v60 = vadd.f32 %v1041_v34, %v328_v57  ;;  %v707_v61 = vpop.f32.mrb[7].mxu0  ;;  %v543_v62 = vmax.f32 %v430_v55, 0.0  ;;  %v433_v63 = vadd.f32 %v1041_v34, %v432_v58  ;;  %v759_v0 = vpop.f32.mrb[7].mxu1 }
 0x102   :  { %566 = vst [vmem:[%s1242_s3 + $0x10] sm:$0xff] %v517_v59  ;;  %v518_v1 = vmax.f32 %v329_v60, 0.0  ;;  %592 = vst [vmem:[%s1242_s3 + $0xe0] sm:$0xff] %v543_v62  ;;  %v544_v2 = vmax.f32 %v433_v63, 0.0 }
 0x104   :  { %567 = vst [vmem:[%s1242_s3 + $0x18] sm:$0xff] %v518_v1  ;;  %593 = vst [vmem:[%s1242_s3 + $0xe8] sm:$0xff] %v544_v2 }
 0x105   :  { %v333_v3 = vpop.f32.mrb[8].mxu0  ;;  %v437_v4 = vpop.f32.mrb[8].mxu1 }
 0x106   :  { %v334_v5 = vadd.f32 %v1041_v34, %v333_v3  ;;  %v710_v6 = vpop.f32.mrb[9].mxu0  ;;  %v438_v7 = vadd.f32 %v1041_v34, %v437_v4  ;;  %v762_v8 = vpop.f32.mrb[9].mxu1 }
 0x107   :  { %v336_v9 = vpop.f32.mrb[10].mxu0  ;;  %v440_v10 = vpop.f32.mrb[10].mxu1 }
 0x108   :  { %v519_v11 = vmax.f32 %v334_v5, 0.0  ;;  %v337_v12 = vadd.f32 %v1041_v34, %v336_v9  ;;  %v711_v13 = vpop.f32.mrb[11].mxu0  ;;  %v545_v14 = vmax.f32 %v438_v7, 0.0  ;;  %v441_v15 = vadd.f32 %v1041_v34, %v440_v10  ;;  %v763_v16 = vpop.f32.mrb[11].mxu1 }
 0x10a   :  { %568 = vst [vmem:[%s1242_s3 + $0x20] sm:$0xff] %v519_v11  ;;  %v520_v17 = vmax.f32 %v337_v12, 0.0  ;;  %594 = vst [vmem:[%s1242_s3 + $0xf0] sm:$0xff] %v545_v14  ;;  %v546_v18 = vmax.f32 %v441_v15, 0.0 }
 0x10c   :  { %569 = vst [vmem:[%s1242_s3 + $0x28] sm:$0xff] %v520_v17  ;;  %595 = vst [vmem:[%s1242_s3 + $0xf8] sm:$0xff] %v546_v18 }
 0x10d   :  { %v341_v19 = vpop.f32.mrb[12].mxu0  ;;  %v445_v20 = vpop.f32.mrb[12].mxu1 }
 0x10e   :  { %v342_v21 = vadd.f32 %v1041_v34, %v341_v19  ;;  %v714_v22 = vpop.f32.mrb[13].mxu0  ;;  %v446_v23 = vadd.f32 %v1041_v34, %v445_v20  ;;  %v766_v24 = vpop.f32.mrb[13].mxu1 }
 0x10f   :  { %v344_v25 = vpop.f32.mrb[14].mxu0  ;;  %v448_v26 = vpop.f32.mrb[14].mxu1 }
 0x110   :  { %v521_v27 = vmax.f32 %v342_v21, 0.0  ;;  %v345_v28 = vadd.f32 %v1041_v34, %v344_v25  ;;  %v715_v29 = vpop.f32.mrb[15].mxu0  ;;  %v547_v30 = vmax.f32 %v446_v23, 0.0  ;;  %v449_v31 = vadd.f32 %v1041_v34, %v448_v26  ;;  %v767_v32 = vpop.f32.mrb[15].mxu1 }
 0x112   :  { %570 = vst [vmem:[%s1242_s3 + $0x30] sm:$0xff] %v521_v27  ;;  %v522_v33 = vmax.f32 %v345_v28, 0.0  ;;  %596 = vst [vmem:[%s1242_s3 + $0x100] sm:$0xff] %v547_v30  ;;  %v548_v35 = vmax.f32 %v449_v31, 0.0 }
 0x114   :  { %571 = vst [vmem:[%s1242_s3 + $0x38] sm:$0xff] %v522_v33  ;;  %597 = vst [vmem:[%s1242_s3 + $0x108] sm:$0xff] %v548_v35 }
 0x115   :  { %v349_v36 = vpop.f32.mrb[16].mxu0  ;;  %v453_v37 = vpop.f32.mrb[16].mxu1 }
 0x116   :  { %v350_v38 = vadd.f32 %v1041_v34, %v349_v36  ;;  %v718_v39 = vpop.f32.mrb[17].mxu0  ;;  %v454_v40 = vadd.f32 %v1041_v34, %v453_v37  ;;  %v770_v41 = vpop.f32.mrb[17].mxu1 }
 0x117   :  { %v352_v42 = vpop.f32.mrb[18].mxu0  ;;  %v456_v43 = vpop.f32.mrb[18].mxu1 }
 0x118   :  { %v523_v44 = vmax.f32 %v350_v38, 0.0  ;;  %v353_v45 = vadd.f32 %v1041_v34, %v352_v42  ;;  %v719_v46 = vpop.f32.mrb[19].mxu0  ;;  %v549_v47 = vmax.f32 %v454_v40, 0.0  ;;  %v457_v48 = vadd.f32 %v1041_v34, %v456_v43  ;;  %v771_v49 = vpop.f32.mrb[19].mxu1 }
 0x11a   :  { %572 = vst [vmem:[%s1242_s3 + $0x40] sm:$0xff] %v523_v44  ;;  %v524_v50 = vmax.f32 %v353_v45, 0.0  ;;  %598 = vst [vmem:[%s1242_s3 + $0x110] sm:$0xff] %v549_v47  ;;  %v550_v51 = vmax.f32 %v457_v48, 0.0 }
 0x11c   :  { %573 = vst [vmem:[%s1242_s3 + $0x48] sm:$0xff] %v524_v50  ;;  %599 = vst [vmem:[%s1242_s3 + $0x118] sm:$0xff] %v550_v51 }
 0x11d   :  { %v357_v52 = vpop.f32.mrb[20].mxu0  ;;  %v461_v53 = vpop.f32.mrb[20].mxu1 }
 0x11e   :  { %v358_v54 = vadd.f32 %v1041_v34, %v357_v52  ;;  %v722_v55 = vpop.f32.mrb[21].mxu0  ;;  %v462_v56 = vadd.f32 %v1041_v34, %v461_v53  ;;  %v774_v57 = vpop.f32.mrb[21].mxu1 }
 0x11f   :  { %v360_v58 = vpop.f32.mrb[22].mxu0  ;;  %v464_v59 = vpop.f32.mrb[22].mxu1 }
 0x120   :  { %v525_v60 = vmax.f32 %v358_v54, 0.0  ;;  %v361_v61 = vadd.f32 %v1041_v34, %v360_v58  ;;  %v723_v62 = vpop.f32.mrb[23].mxu0  ;;  %v551_v63 = vmax.f32 %v462_v56, 0.0  ;;  %v465_v0 = vadd.f32 %v1041_v34, %v464_v59  ;;  %v775_v1 = vpop.f32.mrb[23].mxu1 }
 0x122   :  { %574 = vst [vmem:[%s1242_s3 + $0x50] sm:$0xff] %v525_v60  ;;  %v526_v2 = vmax.f32 %v361_v61, 0.0  ;;  %600 = vst [vmem:[%s1242_s3 + $0x120] sm:$0xff] %v551_v63  ;;  %v552_v3 = vmax.f32 %v465_v0, 0.0 }
 0x124   :  { %575 = vst [vmem:[%s1242_s3 + $0x58] sm:$0xff] %v526_v2  ;;  %601 = vst [vmem:[%s1242_s3 + $0x128] sm:$0xff] %v552_v3 }
 0x125   :  { %v365_v4 = vpop.f32.mrb[24].mxu0  ;;  %v469_v5 = vpop.f32.mrb[24].mxu1 }
 0x126   :  { %v366_v6 = vadd.f32 %v1041_v34, %v365_v4  ;;  %v726_v7 = vpop.f32.mrb[25].mxu0  ;;  %v470_v8 = vadd.f32 %v1041_v34, %v469_v5  ;;  %v778_v9 = vpop.f32.mrb[25].mxu1 }
 0x127   :  { %v368_v10 = vpop.f32.mrb[26].mxu0  ;;  %v472_v11 = vpop.f32.mrb[26].mxu1 }
 0x128   :  { %v527_v12 = vmax.f32 %v366_v6, 0.0  ;;  %v369_v13 = vadd.f32 %v1041_v34, %v368_v10  ;;  %v727_v14 = vpop.f32.mrb[27].mxu0  ;;  %v553_v15 = vmax.f32 %v470_v8, 0.0  ;;  %v473_v16 = vadd.f32 %v1041_v34, %v472_v11  ;;  %v779_v17 = vpop.f32.mrb[27].mxu1 }
 0x12a   :  { %576 = vst [vmem:[%s1242_s3 + $0x60] sm:$0xff] %v527_v12  ;;  %v528_v18 = vmax.f32 %v369_v13, 0.0  ;;  %602 = vst [vmem:[%s1242_s3 + $0x130] sm:$0xff] %v553_v15  ;;  %v554_v19 = vmax.f32 %v473_v16, 0.0 }
 0x12c   :  { %577 = vst [vmem:[%s1242_s3 + $0x68] sm:$0xff] %v528_v18  ;;  %603 = vst [vmem:[%s1242_s3 + $0x138] sm:$0xff] %v554_v19 }
 0x12d   :  { %v373_v20 = vpop.f32.mrb[28].mxu0  ;;  %v477_v21 = vpop.f32.mrb[28].mxu1 }
 0x12e   :  { %v374_v22 = vadd.f32 %v1041_v34, %v373_v20  ;;  %v730_v23 = vpop.f32.mrb[29].mxu0  ;;  %v478_v24 = vadd.f32 %v1041_v34, %v477_v21  ;;  %v782_v25 = vpop.f32.mrb[29].mxu1 }
 0x12f   :  { %v376_v26 = vpop.f32.mrb[30].mxu0  ;;  %v480_v27 = vpop.f32.mrb[30].mxu1 }
 0x130   :  { %v529_v28 = vmax.f32 %v374_v22, 0.0  ;;  %v377_v29 = vadd.f32 %v1041_v34, %v376_v26  ;;  %v731_v30 = vpop.f32.mrb[31].mxu0  ;;  %v555_v31 = vmax.f32 %v478_v24, 0.0  ;;  %v481_v32 = vadd.f32 %v1041_v34, %v480_v27  ;;  %v783_v33 = vpop.f32.mrb[31].mxu1 }
 0x132   :  { %578 = vst [vmem:[%s1242_s3 + $0x70] sm:$0xff] %v529_v28  ;;  %v530_v35 = vmax.f32 %v377_v29, 0.0  ;;  %604 = vst [vmem:[%s1242_s3 + $0x140] sm:$0xff] %v555_v31  ;;  %v556_v36 = vmax.f32 %v481_v32, 0.0 }
 0x134   :  { %579 = vst [vmem:[%s1242_s3 + $0x78] sm:$0xff] %v530_v35  ;;  %605 = vst [vmem:[%s1242_s3 + $0x148] sm:$0xff] %v556_v36 }
 0x135   :  { %v381_v37 = vpop.f32.mrb[32].mxu0  ;;  %v485_v38 = vpop.f32.mrb[32].mxu1 }
 0x136   :  { %v382_v39 = vadd.f32 %v1041_v34, %v381_v37  ;;  %v734_v40 = vpop.f32.mrb[33].mxu0  ;;  %v486_v41 = vadd.f32 %v1041_v34, %v485_v38  ;;  %v786_v42 = vpop.f32.mrb[33].mxu1 }
 0x137   :  { %v384_v43 = vpop.f32.mrb[34].mxu0  ;;  %v488_v44 = vpop.f32.mrb[34].mxu1 }
 0x138   :  { %v531_v45 = vmax.f32 %v382_v39, 0.0  ;;  %v385_v46 = vadd.f32 %v1041_v34, %v384_v43  ;;  %v735_v47 = vpop.f32.mrb[35].mxu0  ;;  %v557_v48 = vmax.f32 %v486_v41, 0.0  ;;  %v489_v49 = vadd.f32 %v1041_v34, %v488_v44  ;;  %v787_v50 = vpop.f32.mrb[35].mxu1 }
 0x13a   :  { %580 = vst [vmem:[%s1242_s3 + $0x80] sm:$0xff] %v531_v45  ;;  %v532_v51 = vmax.f32 %v385_v46, 0.0  ;;  %606 = vst [vmem:[%s1242_s3 + $0x150] sm:$0xff] %v557_v48  ;;  %v558_v52 = vmax.f32 %v489_v49, 0.0 }
 0x13c   :  { %581 = vst [vmem:[%s1242_s3 + $0x88] sm:$0xff] %v532_v51  ;;  %607 = vst [vmem:[%s1242_s3 + $0x158] sm:$0xff] %v558_v52 }
 0x13d   :  { %v389_v53 = vpop.f32.mrb[36].mxu0  ;;  %v493_v54 = vpop.f32.mrb[36].mxu1 }
 0x13e   :  { %v390_v55 = vadd.f32 %v1041_v34, %v389_v53  ;;  %v738_v56 = vpop.f32.mrb[37].mxu0  ;;  %v494_v57 = vadd.f32 %v1041_v34, %v493_v54  ;;  %v790_v58 = vpop.f32.mrb[37].mxu1 }
 0x13f   :  { %v392_v59 = vpop.f32.mrb[38].mxu0  ;;  %v496_v60 = vpop.f32.mrb[38].mxu1 }
 0x140   :  { %v533_v61 = vmax.f32 %v390_v55, 0.0  ;;  %v393_v62 = vadd.f32 %v1041_v34, %v392_v59  ;;  %v739_v63 = vpop.f32.mrb[39].mxu0  ;;  %v559_v0 = vmax.f32 %v494_v57, 0.0  ;;  %v497_v1 = vadd.f32 %v1041_v34, %v496_v60  ;;  %v791_v2 = vpop.f32.mrb[39].mxu1 }
 0x142   :  { %582 = vst [vmem:[%s1242_s3 + $0x90] sm:$0xff] %v533_v61  ;;  %v534_v3 = vmax.f32 %v393_v62, 0.0  ;;  %608 = vst [vmem:[%s1242_s3 + $0x160] sm:$0xff] %v559_v0  ;;  %v560_v4 = vmax.f32 %v497_v1, 0.0 }
 0x144   :  { %583 = vst [vmem:[%s1242_s3 + $0x98] sm:$0xff] %v534_v3  ;;  %609 = vst [vmem:[%s1242_s3 + $0x168] sm:$0xff] %v560_v4 }
 0x145   :  { %v397_v5 = vpop.f32.mrb[40].mxu0  ;;  %v501_v6 = vpop.f32.mrb[40].mxu1 }
 0x146   :  { %v398_v7 = vadd.f32 %v1041_v34, %v397_v5  ;;  %v742_v8 = vpop.f32.mrb[41].mxu0  ;;  %v502_v9 = vadd.f32 %v1041_v34, %v501_v6  ;;  %v794_v10 = vpop.f32.mrb[41].mxu1 }
 0x147   :  { %v400_v11 = vpop.f32.mrb[42].mxu0  ;;  %v504_v12 = vpop.f32.mrb[42].mxu1 }
 0x148   :  { %v535_v13 = vmax.f32 %v398_v7, 0.0  ;;  %v401_v14 = vadd.f32 %v1041_v34, %v400_v11  ;;  %v743_v15 = vpop.f32.mrb[43].mxu0  ;;  %v561_v16 = vmax.f32 %v502_v9, 0.0  ;;  %v505_v17 = vadd.f32 %v1041_v34, %v504_v12  ;;  %v795_v18 = vpop.f32.mrb[43].mxu1 }
 0x14a   :  { %584 = vst [vmem:[%s1242_s3 + $0xa0] sm:$0xff] %v535_v13  ;;  %v536_v19 = vmax.f32 %v401_v14, 0.0  ;;  %610 = vst [vmem:[%s1242_s3 + $0x170] sm:$0xff] %v561_v16  ;;  %v562_v20 = vmax.f32 %v505_v17, 0.0 }
 0x14c   :  { %585 = vst [vmem:[%s1242_s3 + $0xa8] sm:$0xff] %v536_v19  ;;  %611 = vst [vmem:[%s1242_s3 + $0x178] sm:$0xff] %v562_v20 }
 0x14d   :  { %v405_v21 = vpop.f32.mrb[44].mxu0  ;;  %v509_v22 = vpop.f32.mrb[44].mxu1 }
 0x14e   :  { %v406_v23 = vadd.f32 %v1041_v34, %v405_v21  ;;  %v746_v24 = vpop.f32.mrb[45].mxu0  ;;  %v510_v25 = vadd.f32 %v1041_v34, %v509_v22  ;;  %v798_v26 = vpop.f32.mrb[45].mxu1 }
 0x14f   :  { %v408_v27 = vpop.f32.mrb[46].mxu0  ;;  %v512_v28 = vpop.f32.mrb[46].mxu1 }
 0x150   :  { %v537_v29 = vmax.f32 %v406_v23, 0.0  ;;  %v409_v30 = vadd.f32 %v1041_v34, %v408_v27  ;;  %v747_v31 = vpop.f32.mrb[47].mxu0  ;;  %v563_v32 = vmax.f32 %v510_v25, 0.0  ;;  %v799_v33 = vpop.f32.mrb[47].mxu1 }
 0x152   :  { %586 = vst [vmem:[%s1242_s3 + $0xb0] sm:$0xff] %v537_v29  ;;  %v538_v35 = vmax.f32 %v409_v30, 0.0  ;;  %612 = vst [vmem:[%s1242_s3 + $0x180] sm:$0xff] %v563_v32 }
 0x154   :  { %587 = vst [vmem:[%s1242_s3 + $0xb8] sm:$0xff] %v538_v35 }
 0x155   :  { %v413_v36 = vpop.f32.mrb[48].mxu0 }
 0x156   :  { %v414_v37 = vadd.f32 %v1041_v34, %v413_v36  ;;  %v750_v38 = vpop.f32.mrb[49].mxu0 }
 0x157   :  { %v416_v39 = vpop.f32.mrb[50].mxu0 }
 0x158   :  { %v539_v40 = vmax.f32 %v414_v37, 0.0  ;;  %v417_v41 = vadd.f32 %v1041_v34, %v416_v39  ;;  %v751_v42 = vpop.f32.mrb[51].mxu0 }
 0x15a   :  { %588 = vst [vmem:[%s1242_s3 + $0xc0] sm:$0xff] %v539_v40  ;;  %v540_v43 = vmax.f32 %v417_v41, 0.0 }
 0x15c   :  { %589 = vst [vmem:[%s1242_s3 + $0xc8] sm:$0xff] %v540_v43 }

// kernel: tdcnn_forward.4
= control target key start
LH: loop header
LB: loop body
LE: loop exit
PB: predicated region body
PF: predicated region fallthrough
CT: control target
= control target key end

     0   :  { %s805_s1 = inlined_call_operand.vmem [shape: bf16[128,128], index: 1, kind: input, shape index: {}]   ;;  %s806_s0 = inlined_call_operand.vmem [shape: bf16[256,128], index: 0, kind: input, shape index: {}]   ;;  %s807_s2 = inlined_call_operand.vmem [shape: f32[1,128], index: 2, kind: input, shape index: {}]   ;;  %s808_s3 = inlined_call_operand.vmem [shape: f32[256,128], index: 3, kind: output, shape index: {}]  }
   0x1   :  { %v556_v0 = vld [vmem:[%s805_s1] sm:$0xff]   ;;  %v557_v1 = vld [vmem:[%s805_s1 + $0x8] sm:$0xff]   ;;  %v558_v2 = vld [vmem:[%s805_s1 + $0x10] sm:$0xff]  }
   0x2   :  { %492 = vmatprep.subr.bf16.mxu0 %v556_v0  ;;  %540 = vmatprep.subr.bf16.mxu1 %v556_v0  ;;  %v559_v3 = vld [vmem:[%s805_s1 + $0x18] sm:$0xff]   ;;  %v564_v4 = vld [vmem:[%s806_s0] sm:$0xff]   ;;  %v561_v7 = vld [vmem:[%s805_s1 + $0x28] sm:$0xff]  }
   0x3   :  { %493 = vmatpush3.bf16.msra.mxu0 %v556_v0  ;;  %548 = vmatpush3.bf16.msra.mxu1 %v556_v0  ;;  %v565_v5 = vld [vmem:[%s806_s0 + $0x40] sm:$0xff]   ;;  %v562_v8 = vld [vmem:[%s805_s1 + $0x30] sm:$0xff]   ;;  %v563_v9 = vld [vmem:[%s805_s1 + $0x38] sm:$0xff]  }
   0x4   :  { %494 = vmatprep.subr.bf16.mxu0 %v557_v1  ;;  %541 = vmatprep.subr.bf16.mxu1 %v557_v1  ;;  %v560_v6 = vld [vmem:[%s805_s1 + $0x20] sm:$0xff]   ;;  %v566_v10 = vld [vmem:[%s806_s0 + $0x8] sm:$0xff]   ;;  %v568_v12 = vld [vmem:[%s806_s0 + $0x10] sm:$0xff]  }
   0x5   :  { %508 = vmatprep.mubr.bf16.mxu0 %v564_v4  ;;  %524 = vmatprep.mubr.bf16.mxu1 %v565_v5  ;;  %v567_v11 = vld [vmem:[%s806_s0 + $0x48] sm:$0xff]   ;;  %v569_v13 = vld [vmem:[%s806_s0 + $0x50] sm:$0xff]   ;;  %v570_v14 = vld [vmem:[%s806_s0 + $0x18] sm:$0xff]  }
   0x6   :  { %v571_v15 = vld [vmem:[%s806_s0 + $0x58] sm:$0xff]   ;;  %v572_v16 = vld [vmem:[%s806_s0 + $0x20] sm:$0xff]   ;;  %v574_v18 = vld [vmem:[%s806_s0 + $0x28] sm:$0xff]  }
   0x7   :  { %495 = vmatpush3.bf16.msra.mxu0 %v557_v1  ;;  %549 = vmatpush3.bf16.msra.mxu1 %v557_v1  ;;  %v573_v17 = vld [vmem:[%s806_s0 + $0x60] sm:$0xff]   ;;  %v575_v19 = vld [vmem:[%s806_s0 + $0x68] sm:$0xff]   ;;  %v576_v20 = vld [vmem:[%s806_s0 + $0x30] sm:$0xff]  }
   0x8   :  { %496 = vmatprep.subr.bf16.mxu0 %v558_v2  ;;  %542 = vmatprep.subr.bf16.mxu1 %v558_v2  ;;  %v577_v21 = vld [vmem:[%s806_s0 + $0x70] sm:$0xff]   ;;  %v578_v22 = vld [vmem:[%s806_s0 + $0x38] sm:$0xff]   ;;  %v675_v24 = vld [vmem:[%s807_s2] ss:$0 sm:$0xff] }
   0x9   :  { %v579_v23 = vld [vmem:[%s806_s0 + $0x78] sm:$0xff]  }
   0xb   :  { %497 = vmatpush3.bf16.msra.mxu0 %v558_v2  ;;  %550 = vmatpush3.bf16.msra.mxu1 %v558_v2 }
   0xc   :  { %498 = vmatprep.subr.bf16.mxu0 %v559_v3  ;;  %543 = vmatprep.subr.bf16.mxu1 %v559_v3 }
   0xf   :  { %499 = vmatpush3.bf16.msra.mxu0 %v559_v3  ;;  %551 = vmatpush3.bf16.msra.mxu1 %v559_v3 }
  0x10   :  { %500 = vmatprep.subr.bf16.mxu0 %v560_v6  ;;  %544 = vmatprep.subr.bf16.mxu1 %v560_v6 }
  0x13   :  { %501 = vmatpush3.bf16.msra.mxu0 %v560_v6  ;;  %552 = vmatpush3.bf16.msra.mxu1 %v560_v6 }
  0x14   :  { %502 = vmatprep.subr.bf16.mxu0 %v561_v7  ;;  %545 = vmatprep.subr.bf16.mxu1 %v561_v7 }
  0x17   :  { %503 = vmatpush3.bf16.msra.mxu0 %v561_v7  ;;  %553 = vmatpush3.bf16.msra.mxu1 %v561_v7 }
  0x18   :  { %504 = vmatprep.subr.bf16.mxu0 %v562_v8  ;;  %546 = vmatprep.subr.bf16.mxu1 %v562_v8 }
  0x1b   :  { %505 = vmatpush3.bf16.msra.mxu0 %v562_v8  ;;  %554 = vmatpush3.bf16.msra.mxu1 %v562_v8 }
  0x1c   :  { %506 = vmatprep.subr.bf16.mxu0 %v563_v9  ;;  %547 = vmatprep.subr.bf16.mxu1 %v563_v9 }
  0x1f   :  { %507 = vmatpush3.bf16.msra.mxu0 %v563_v9  ;;  %555 = vmatpush3.bf16.msra.mxu1 %v563_v9 }
  0x22   :  { %509 = vmatmul.mubr.bf16.vlgmr.msra.gmra.mrb[0].mxu0 %v566_v10  ;;  %525 = vmatmul.mubr.bf16.vlgmr.msra.gmra.mrb[0].mxu1 %v567_v11 }
  0x23   :  { %512 = vmatprep.mubr.bf16.mxu0 %v568_v12  ;;  %528 = vmatprep.mubr.bf16.mxu1 %v569_v13 }
  0x2a   :  { %513 = vmatmul.mubr.bf16.gmra.mrb[4].mxu0 %v570_v14  ;;  %529 = vmatmul.mubr.bf16.gmra.mrb[4].mxu1 %v571_v15 }
  0x2b   :  { %516 = vmatprep.mubr.bf16.mxu0 %v572_v16  ;;  %532 = vmatprep.mubr.bf16.mxu1 %v573_v17 }
  0x32   :  { %517 = vmatmul.mubr.bf16.gmra.mrb[8].mxu0 %v574_v18  ;;  %533 = vmatmul.mubr.bf16.gmra.mrb[8].mxu1 %v575_v19 }
  0x33   :  { %520 = vmatprep.mubr.bf16.mxu0 %v576_v20  ;;  %536 = vmatprep.mubr.bf16.mxu1 %v577_v21 }
  0x3a   :  { %521 = vmatmul.mubr.bf16.gmra.mrb[12].mxu0 %v578_v22  ;;  %537 = vmatmul.mubr.bf16.gmra.mrb[12].mxu1 %v579_v23 }
  0xf5   :  { %v510_v25 = vpop.f32.mrb[0].mxu0  ;;  %v526_v26 = vpop.f32.mrb[0].mxu1 }
  0xf6   :  { %v257_v27 = vadd.f32 %v510_v25, %v675_v24  ;;  %v321_v28 = vadd.f32 %v526_v26, %v675_v24  ;;  %v248_v29 = vpop.f32.mrb[1].mxu0  ;;  %v312_v30 = vpop.f32.mrb[1].mxu1 }
  0xf7   :  { %v249_v31 = vadd.f32 %v675_v24, %v248_v29  ;;  %v313_v32 = vadd.f32 %v675_v24, %v312_v30  ;;  %v511_v33 = vpop.f32.mrb[2].mxu0  ;;  %v527_v34 = vpop.f32.mrb[2].mxu1 }
  0xf8   :  { %v377_v35 = vmax.f32 %v257_v27, 0.0  ;;  %v393_v36 = vmax.f32 %v321_v28, 0.0  ;;  %v260_v37 = vadd.f32 %v511_v33, %v675_v24  ;;  %v324_v38 = vadd.f32 %v527_v34, %v675_v24  ;;  %v251_v39 = vpop.f32.mrb[3].mxu0  ;;  %v315_v40 = vpop.f32.mrb[3].mxu1 }
  0xf9   :  { %v375_v41 = vmax.f32 %v249_v31, 0.0  ;;  %v391_v42 = vmax.f32 %v313_v32, 0.0  ;;  %v252_v43 = vadd.f32 %v675_v24, %v251_v39  ;;  %v316_v44 = vadd.f32 %v675_v24, %v315_v40 }
  0xfa   :  { %409 = vst [vmem:[%s808_s3 + $0x10] sm:$0xff] %v377_v35  ;;  %425 = vst [vmem:[%s808_s3 + $0x90] sm:$0xff] %v393_v36  ;;  %v378_v45 = vmax.f32 %v260_v37, 0.0  ;;  %v394_v46 = vmax.f32 %v324_v38, 0.0 }
  0xfb   :  { %407 = vst [vmem:[%s808_s3] sm:$0xff] %v375_v41  ;;  %423 = vst [vmem:[%s808_s3 + $0x80] sm:$0xff] %v391_v42  ;;  %v376_v47 = vmax.f32 %v252_v43, 0.0  ;;  %v392_v48 = vmax.f32 %v316_v44, 0.0 }
  0xfc   :  { %410 = vst [vmem:[%s808_s3 + $0x18] sm:$0xff] %v378_v45  ;;  %426 = vst [vmem:[%s808_s3 + $0x98] sm:$0xff] %v394_v46 }
  0xfd   :  { %408 = vst [vmem:[%s808_s3 + $0x8] sm:$0xff] %v376_v47  ;;  %424 = vst [vmem:[%s808_s3 + $0x88] sm:$0xff] %v392_v48  ;;  %v514_v49 = vpop.f32.mrb[4].mxu0  ;;  %v530_v50 = vpop.f32.mrb[4].mxu1 }
  0xfe   :  { %v273_v51 = vadd.f32 %v514_v49, %v675_v24  ;;  %v337_v52 = vadd.f32 %v530_v50, %v675_v24  ;;  %v264_v53 = vpop.f32.mrb[5].mxu0  ;;  %v328_v54 = vpop.f32.mrb[5].mxu1 }
  0xff   :  { %v265_v55 = vadd.f32 %v675_v24, %v264_v53  ;;  %v329_v56 = vadd.f32 %v675_v24, %v328_v54  ;;  %v515_v57 = vpop.f32.mrb[6].mxu0  ;;  %v531_v58 = vpop.f32.mrb[6].mxu1 }
 0x100   :  { %v381_v59 = vmax.f32 %v273_v51, 0.0  ;;  %v397_v60 = vmax.f32 %v337_v52, 0.0  ;;  %v276_v61 = vadd.f32 %v515_v57, %v675_v24  ;;  %v340_v62 = vadd.f32 %v531_v58, %v675_v24  ;;  %v267_v63 = vpop.f32.mrb[7].mxu0  ;;  %v331_v0 = vpop.f32.mrb[7].mxu1 }
 0x101   :  { %v379_v1 = vmax.f32 %v265_v55, 0.0  ;;  %v395_v2 = vmax.f32 %v329_v56, 0.0  ;;  %v268_v3 = vadd.f32 %v675_v24, %v267_v63  ;;  %v332_v4 = vadd.f32 %v675_v24, %v331_v0 }
 0x102   :  { %413 = vst [vmem:[%s808_s3 + $0x30] sm:$0xff] %v381_v59  ;;  %429 = vst [vmem:[%s808_s3 + $0xb0] sm:$0xff] %v397_v60  ;;  %v382_v5 = vmax.f32 %v276_v61, 0.0  ;;  %v398_v6 = vmax.f32 %v340_v62, 0.0 }
 0x103   :  { %411 = vst [vmem:[%s808_s3 + $0x20] sm:$0xff] %v379_v1  ;;  %427 = vst [vmem:[%s808_s3 + $0xa0] sm:$0xff] %v395_v2  ;;  %v380_v7 = vmax.f32 %v268_v3, 0.0  ;;  %v396_v8 = vmax.f32 %v332_v4, 0.0 }
 0x104   :  { %414 = vst [vmem:[%s808_s3 + $0x38] sm:$0xff] %v382_v5  ;;  %430 = vst [vmem:[%s808_s3 + $0xb8] sm:$0xff] %v398_v6 }
 0x105   :  { %412 = vst [vmem:[%s808_s3 + $0x28] sm:$0xff] %v380_v7  ;;  %428 = vst [vmem:[%s808_s3 + $0xa8] sm:$0xff] %v396_v8  ;;  %v518_v9 = vpop.f32.mrb[8].mxu0  ;;  %v534_v10 = vpop.f32.mrb[8].mxu1 }
 0x106   :  { %v289_v11 = vadd.f32 %v518_v9, %v675_v24  ;;  %v353_v12 = vadd.f32 %v534_v10, %v675_v24  ;;  %v280_v13 = vpop.f32.mrb[9].mxu0  ;;  %v344_v14 = vpop.f32.mrb[9].mxu1 }
 0x107   :  { %v281_v15 = vadd.f32 %v675_v24, %v280_v13  ;;  %v345_v16 = vadd.f32 %v675_v24, %v344_v14  ;;  %v519_v17 = vpop.f32.mrb[10].mxu0  ;;  %v535_v18 = vpop.f32.mrb[10].mxu1 }
 0x108   :  { %v385_v19 = vmax.f32 %v289_v11, 0.0  ;;  %v401_v20 = vmax.f32 %v353_v12, 0.0  ;;  %v292_v21 = vadd.f32 %v519_v17, %v675_v24  ;;  %v356_v22 = vadd.f32 %v535_v18, %v675_v24  ;;  %v283_v23 = vpop.f32.mrb[11].mxu0  ;;  %v347_v25 = vpop.f32.mrb[11].mxu1 }
 0x109   :  { %v383_v26 = vmax.f32 %v281_v15, 0.0  ;;  %v399_v27 = vmax.f32 %v345_v16, 0.0  ;;  %v284_v28 = vadd.f32 %v675_v24, %v283_v23  ;;  %v348_v29 = vadd.f32 %v675_v24, %v347_v25 }
 0x10a   :  { %417 = vst [vmem:[%s808_s3 + $0x50] sm:$0xff] %v385_v19  ;;  %433 = vst [vmem:[%s808_s3 + $0xd0] sm:$0xff] %v401_v20  ;;  %v386_v30 = vmax.f32 %v292_v21, 0.0  ;;  %v402_v31 = vmax.f32 %v356_v22, 0.0 }
 0x10b   :  { %415 = vst [vmem:[%s808_s3 + $0x40] sm:$0xff] %v383_v26  ;;  %431 = vst [vmem:[%s808_s3 + $0xc0] sm:$0xff] %v399_v27  ;;  %v384_v32 = vmax.f32 %v284_v28, 0.0  ;;  %v400_v33 = vmax.f32 %v348_v29, 0.0 }
 0x10c   :  { %418 = vst [vmem:[%s808_s3 + $0x58] sm:$0xff] %v386_v30  ;;  %434 = vst [vmem:[%s808_s3 + $0xd8] sm:$0xff] %v402_v31 }
 0x10d   :  { %416 = vst [vmem:[%s808_s3 + $0x48] sm:$0xff] %v384_v32  ;;  %432 = vst [vmem:[%s808_s3 + $0xc8] sm:$0xff] %v400_v33  ;;  %v522_v34 = vpop.f32.mrb[12].mxu0  ;;  %v538_v35 = vpop.f32.mrb[12].mxu1 }
 0x10e   :  { %v305_v36 = vadd.f32 %v522_v34, %v675_v24  ;;  %v369_v37 = vadd.f32 %v538_v35, %v675_v24  ;;  %v296_v38 = vpop.f32.mrb[13].mxu0  ;;  %v360_v39 = vpop.f32.mrb[13].mxu1 }
 0x10f   :  { %v297_v40 = vadd.f32 %v675_v24, %v296_v38  ;;  %v361_v41 = vadd.f32 %v675_v24, %v360_v39  ;;  %v523_v42 = vpop.f32.mrb[14].mxu0  ;;  %v539_v43 = vpop.f32.mrb[14].mxu1 }
 0x110   :  { %v389_v44 = vmax.f32 %v305_v36, 0.0  ;;  %v405_v45 = vmax.f32 %v369_v37, 0.0  ;;  %v308_v46 = vadd.f32 %v523_v42, %v675_v24  ;;  %v372_v47 = vadd.f32 %v539_v43, %v675_v24  ;;  %v299_v48 = vpop.f32.mrb[15].mxu0  ;;  %v363_v49 = vpop.f32.mrb[15].mxu1 }
 0x111   :  { %v387_v50 = vmax.f32 %v297_v40, 0.0  ;;  %v403_v51 = vmax.f32 %v361_v41, 0.0  ;;  %v300_v52 = vadd.f32 %v675_v24, %v299_v48  ;;  %v364_v53 = vadd.f32 %v675_v24, %v363_v49 }
 0x112   :  { %421 = vst [vmem:[%s808_s3 + $0x70] sm:$0xff] %v389_v44  ;;  %437 = vst [vmem:[%s808_s3 + $0xf0] sm:$0xff] %v405_v45  ;;  %v390_v54 = vmax.f32 %v308_v46, 0.0  ;;  %v406_v55 = vmax.f32 %v372_v47, 0.0 }
 0x113   :  { %419 = vst [vmem:[%s808_s3 + $0x60] sm:$0xff] %v387_v50  ;;  %435 = vst [vmem:[%s808_s3 + $0xe0] sm:$0xff] %v403_v51  ;;  %v388_v56 = vmax.f32 %v300_v52, 0.0  ;;  %v404_v24 = vmax.f32 %v364_v53, 0.0 }
 0x114   :  { %422 = vst [vmem:[%s808_s3 + $0x78] sm:$0xff] %v390_v54  ;;  %438 = vst [vmem:[%s808_s3 + $0xf8] sm:$0xff] %v406_v55 }
 0x115   :  { %420 = vst [vmem:[%s808_s3 + $0x68] sm:$0xff] %v388_v56  ;;  %436 = vst [vmem:[%s808_s3 + $0xe8] sm:$0xff] %v404_v24 }

// kernel: tdcnn_forward.5
= control target key start
LH: loop header
LB: loop body
LE: loop exit
PB: predicated region body
PF: predicated region fallthrough
CT: control target
= control target key end

     0   :  { %s791_s0 = inlined_call_operand.vmem [shape: s32[8], index: 0, kind: input, shape index: {}]   ;;  %s792_s3 = inlined_call_operand.vmem [shape: f32[2,8,4,4,128], index: 3, kind: input, shape index: {}]   ;;  %s793_s4 = inlined_call_operand.vmem [shape: f32[8,1,128], index: 4, kind: output, shape index: {}]   ;;  %s794_s1 = inlined_call_operand.vmem [shape: s32[8], index: 1, kind: input, shape index: {}]   ;;  %s795_s2 = inlined_call_operand.vmem [shape: s32[8], index: 2, kind: input, shape index: {}]  }
   0x1   :  { %s9_s17 = sshll.u32 %s791_s0, 4  ;;  %s13_s20 = sshll.u32 %s794_s1, 4  ;;  %s10_s17 = int_to_ptr.vmem [resolvable:$true] %s9_s17  ;;  %s14_s20 = int_to_ptr.vmem [resolvable:$true] %s13_s20 }
   0x2   :  { %s398_s21 = scalar_lea.vmem %s10_s17, 16  ;;  %p403_p1 = scmp.lt.s32.totalorder %s10_s17, %s10_s17 }
   0x3   :  { %p399_p0 = scmp.ne.s32.totalorder %s10_s17, %s398_s21  ;;  %p404_p2 = scmp.lt.s32.totalorder %s398_s21, %s398_s21 }
   0x5   :  { %p405_p3 = por %p404_p2, %p403_p1 }
   0x7   :  { %p406_p4 = pnand %p405_p3, %p399_p0 }
   0x9   :  { %409 = shalt.err (!%p406_p4)  }
   0xa   :  { %s444_s22 = smov [#allocation3]   ;;  %s410_s23 = scalar_lea.vmem %s14_s20, 16 }
   0xb   :  { %12 = dma.vmem_to_smem %s10_s17, 16, %s444_s22, [#allocation2] }
   0xc   :  { %p411_p5 = scmp.ne.s32.totalorder %s14_s20, %s410_s23  ;;  %p415_p6 = scmp.lt.s32.totalorder %s14_s20, %s14_s20 }
   0xd   :  { %p416_p7 = scmp.lt.s32.totalorder %s410_s23, %s410_s23 }
   0xf   :  { %p417_p8 = por %p416_p7, %p415_p6 }
  0x11   :  { %p418_p9 = pnand %p417_p8, %p411_p5 }
  0x13   :  { %421 = shalt.err (!%p418_p9)  }
  0x14   :  { %s445_s0 = smov [#allocation4]   ;;  %s17_s25 = sshll.u32 %s795_s2, 4  ;;  %s18_s25 = int_to_ptr.vmem [resolvable:$true] %s17_s25 }
  0x15   :  { %16 = dma.vmem_to_smem %s14_s20, 16, %s445_s0, [#allocation2] }
  0x16   :  { %s422_s26 = scalar_lea.vmem %s18_s25, 16  ;;  %p427_p11 = scmp.lt.s32.totalorder %s18_s25, %s18_s25 }
  0x17   :  { %p423_p10 = scmp.ne.s32.totalorder %s18_s25, %s422_s26  ;;  %p428_p12 = scmp.lt.s32.totalorder %s422_s26, %s422_s26 }
  0x19   :  { %p429_p13 = por %p428_p12, %p427_p11 }
  0x1b   :  { %p430_p0 = pnand %p429_p13, %p423_p10 }
  0x1d   :  { %433 = shalt.err (!%p430_p0)  }
  0x1e   :  { %s446_s27 = smov [#allocation5]  }
  0x1f   :  { %20 = dma.vmem_to_smem %s18_s25, 16, %s446_s27, [#allocation2] }
  0x20   :  { %438 = dma.done.wait [#allocation2], 48 }
  0x21   :  { %439 = vsyncadd [#allocation2], 4294967248 }
  0x22   :  { %22 = sfence }
  0x23   :  { %s481_s28 = smov 0  }
  0x24 LB: > { %s487_s2 = sadd.s32 4294967295, %s442_s28   ;;  %p381_p1 = scmp.ge.s32.totalorder %s442_s28, 1  ;;  %s442_s28 = sphi %s481_s28, %s28_s28  }
  0x25   : > { %p108_p2 = scmp.lt.s32.totalorder %s442_s28, 9 }
  0x27   : > { %p109_p3 = pnand %p381_p1, %p108_p2 }
  0x28   : > { %s127_s29 = sld [smem:[#allocation3 + %s487_s2]] (!%p109_p3)  ;;  %vm245_vm15 = vcmask (!%p109_p3), 1043456   ;;  %p134_p5 = scmp.lt.s32.totalorder (!%p109_p3), %s487_s2, 7 }
  0x29   : > { %112 = sbr.rel (%p109_p3) target bundleno = 113 (0x71), region = 24  ;;  %s137_s30 = sld [smem:[#allocation4 + %s487_s2]] (!%p109_p3) }
  0x2a   : > { %s138_s5 = sld [smem:[#allocation5 + %s487_s2]] (!%p109_p3) }
  0x2e   : > { %p128_p4 = scmp.lt.s32.totalorder (!%p109_p3), %s127_s29, 1 }
  0x2f   : > { %v494_v0 = vstv (!%p109_p3), %s137_s30 }
  0x30   : > { %s814_s29 = smov (!%p128_p4, %s127_s29), 1  ;;  %v496_v1 = vstv %s138_s5  ;;  %vm172_vm0 = vcmp.le.s32.totalorder %v494_v0, 0  ;;  %vm173_vm2 = vcmp.le.s32.totalorder %v494_v0, 1  ;;  %vm174_vm3 = vcmp.le.s32.totalorder %v494_v0, 2  ;;  %s816_s2 = smov (!%p134_p5, %s487_s2), 7 }
  0x31   : > { %s386_s6 = sshll.u32 %s814_s29, 7  ;;  %vm181_vm1 = vcmp.ge.s32.totalorder %v496_v1, 0  ;;  %vm175_vm4 = vcmp.le.s32.totalorder %v494_v0, 3  ;;  %vm176_vm5 = vcmp.le.s32.totalorder %v494_v0, 4  ;;  %vm177_vm6 = vcmp.le.s32.totalorder %v494_v0, 5  ;;  %s136_s12 = scalar_lea.vmem %s793_s4, %s816_s2 }
  0x32   : > { %s501_s9 = scalar_lea.vmem %s792_s3, %s386_s6  ;;  %vm182_vm7 = vcmp.ge.s32.totalorder %v496_v1, 1  ;;  %vm183_vm8 = vcmp.ge.s32.totalorder %v496_v1, 2  ;;  %vm184_vm9 = vcmp.ge.s32.totalorder %v496_v1, 3  ;;  %vm185_vm11 = vcmp.ge.s32.totalorder %v496_v1, 4  ;;  %vm524_vm13 = vmand %vm172_vm0, %vm181_vm1 }
  0x33   : > { %v514_v2 = vld [vmem:[%s501_s9] sm:$0xf]  ;;  %v517_v3 = vld [vmem:[%s501_s9 + $0x4] sm:$0xf]  ;;  %vm186_vm12 = vcmp.ge.s32.totalorder %v496_v1, 5  ;;  %vm179_vm14 = vcmp.le.s32.totalorder %v494_v0, 7  ;;  %vm560_vm10 = vmand %vm173_vm2, %vm182_vm7 }
  0x34   : > { %v529_v5 = vld [vmem:[%s501_s9 + $0x8] sm:$0xf]  ;;  %v532_v6 = vld [vmem:[%s501_s9 + $0xc] sm:$0xf]  ;;  %v535_v7 = vld [vmem:[%s501_s9 + $0x10] sm:$0xf] }
  0x35   : > { %v538_v8 = vld [vmem:[%s501_s9 + $0x14] sm:$0xf]  ;;  %v541_v9 = vld [vmem:[%s501_s9 + $0x18] sm:$0xf]  ;;  %v544_v10 = vld [vmem:[%s501_s9 + $0x1c] sm:$0xf] }
  0x36   : > { %v147_v11 = vld [vmem:[%s501_s9 + $0x20] sm:$0xf]  ;;  %v549_v12 = vld [vmem:[%s501_s9 + $0x24] sm:$0xf]  ;;  %v552_v13 = vld [vmem:[%s501_s9 + $0x28] sm:$0xf] }
  0x37   : > { %vm187_vm0 = vcmp.ge.s32.totalorder %v496_v1, 6  ;;  %vm188_vm1 = vcmp.ge.s32.totalorder %v496_v1, 7  ;;  %v565_v15 = vld [vmem:[%s501_s9 + $0x2c] sm:$0xf]  ;;  %v151_v16 = vld [vmem:[%s501_s9 + $0x30] sm:$0xf]  ;;  %vm582_vm2 = vmand %vm174_vm3, %vm183_vm8 }
  0x38   : > { %v569_v17 = vld [vmem:[%s501_s9 + $0x34] sm:$0xf]  ;;  %v572_v18 = vld [vmem:[%s501_s9 + $0x38] sm:$0xf]  ;;  %v575_v19 = vld [vmem:[%s501_s9 + $0x3c] sm:$0xf] }
  0x39   : > { %v155_v20 = vld [vmem:[%s501_s9 + $0x40] sm:$0xf]  ;;  %v213_v22 = vsel %vm524_vm13, %v514_v2, -1e+30  ;;  %v214_v23 = vsel %vm524_vm13, %v517_v3, -1e+30  ;;  %vm605_vm3 = vmand %vm175_vm4, %vm184_vm9 }
  0x3a   : > { %v593_v24 = vld [vmem:[%s501_s9 + $0x44] sm:$0xf]  ;;  %v596_v25 = vld [vmem:[%s501_s9 + $0x48] sm:$0xf]  ;;  %v599_v26 = vld [vmem:[%s501_s9 + $0x4c] sm:$0xf] }
  0x3b   : > { %v215_v28 = vsel %vm524_vm13, %v529_v5, -1e+30  ;;  %v216_v29 = vsel %vm524_vm13, %v532_v6, -1e+30  ;;  %v217_v30 = vsel %vm560_vm10, %v535_v7, -1e+30  ;;  %vm627_vm4 = vmand %vm176_vm5, %vm185_vm11 }
  0x3c   : > { %v159_v31 = vld [vmem:[%s501_s9 + $0x50] sm:$0xf]  ;;  %v160_v32 = vld [vmem:[%s501_s9 + $0x54] sm:$0xf]  ;;  %v621_v33 = vld [vmem:[%s501_s9 + $0x58] sm:$0xf] }
  0x3d   : > { %v218_v35 = vsel %vm560_vm10, %v538_v8, -1e+30  ;;  %v219_v36 = vsel %vm560_vm10, %v541_v9, -1e+30  ;;  %v220_v37 = vsel %vm560_vm10, %v544_v10, -1e+30  ;;  %vm662_vm5 = vmand %vm177_vm6, %vm186_vm12 }
  0x3e   : > { %v641_v38 = vld [vmem:[%s501_s9 + $0x5c] sm:$0xf]  ;;  %v221_v39 = vsel %vm582_vm2, %v147_v11, -1e+30  ;;  %v222_v40 = vsel %vm582_vm2, %v549_v12, -1e+30  ;;  %vm715_vm8 = vmand %vm179_vm14, %vm188_vm1 }
  0x3f   : > { %v223_v41 = vsel %vm582_vm2, %v552_v13, -1e+30  ;;  %v163_v42 = vld [vmem:[%s501_s9 + $0x60] sm:$0xf]  ;;  %v653_v43 = vld [vmem:[%s501_s9 + $0x64] sm:$0xf] }
  0x40   : > { %v656_v44 = vld [vmem:[%s501_s9 + $0x68] sm:$0xf]  ;;  %v224_v46 = vsel %vm582_vm2, %v565_v15, -1e+30  ;;  %v225_v47 = vsel %vm605_vm3, %v151_v16, -1e+30 }
  0x41   : > { %v226_v48 = vsel %vm605_vm3, %v569_v17, -1e+30  ;;  %v675_v49 = vld [vmem:[%s501_s9 + $0x6c] sm:$0xf]  ;;  %v227_v50 = vsel %vm605_vm3, %v572_v18, -1e+30 }
  0x42   : > { %v228_v51 = vsel %vm605_vm3, %v575_v19, -1e+30  ;;  %v229_v52 = vsel %vm627_vm4, %v155_v20, -1e+30  ;;  %v167_v53 = vld [vmem:[%s501_s9 + $0x70] sm:$0xf] }
  0x43   : > { %vm808_vm6 = vcmp.le.s32.totalorder %v494_v0, 6  ;;  %v230_v55 = vsel %vm627_vm4, %v593_v24, -1e+30  ;;  %v231_v56 = vsel %vm627_vm4, %v596_v25, -1e+30  ;;  %v246_v2 = vsel %vm245_vm15, %v213_v22, -inf }
  0x44   : > { %vm690_vm7 = vmand %vm808_vm6, %vm187_vm0  ;;  %v232_v57 = vsel %vm627_vm4, %v599_v26, -1e+30  ;;  %v168_v58 = vld [vmem:[%s501_s9 + $0x74] sm:$0xf]  ;;  %v233_v59 = vsel %vm662_vm5, %v159_v31, -1e+30 }
  0x45   : > { %v234_v60 = vsel %vm662_vm5, %v160_v32, -1e+30  ;;  %v235_v61 = vsel %vm662_vm5, %v621_v33, -1e+30  ;;  %v236_v63 = vsel %vm662_vm5, %v641_v38, -1e+30 }
  0x46   : > { %v247_v3 = vsel %vm245_vm15, %v217_v30, -inf  ;;  %v249_v5 = vsel %vm245_vm15, %v221_v39, -inf  ;;  %v237_v7 = vsel %vm690_vm7, %v163_v42, -1e+30  ;;  %v238_v0 = vsel %vm690_vm7, %v653_v43, -1e+30 }
  0x47   : > { %v239_v1 = vsel %vm690_vm7, %v656_v44, -1e+30  ;;  %v248_v8 = vmax.f32 %v246_v2, %v247_v3  ;;  %v240_v9 = vsel %vm690_vm7, %v675_v49, -1e+30  ;;  %v251_v10 = vsel %vm245_vm15, %v225_v47, -inf }
  0x48   : > { %v261_v11 = vsel %vm245_vm15, %v214_v23, -inf  ;;  %v262_v12 = vsel %vm245_vm15, %v218_v35, -inf  ;;  %v241_v13 = vsel %vm715_vm8, %v167_v53, -1e+30  ;;  %v264_v16 = vsel %vm245_vm15, %v222_v40, -inf }
  0x49   : > { %v250_v14 = vmax.f32 %v248_v8, %v249_v5  ;;  %v263_v15 = vmax.f32 %v261_v11, %v262_v12  ;;  %v242_v17 = vsel %vm715_vm8, %v168_v58, -1e+30  ;;  %v253_v18 = vsel %vm245_vm15, %v229_v52, -inf  ;;  %v169_v39 = vld [vmem:[%s501_s9 + $0x78] sm:$0xf] }
  0x4a   : > { %v255_v19 = vsel %vm245_vm15, %v233_v59, -inf  ;;  %v266_v20 = vsel %vm245_vm15, %v226_v48, -inf  ;;  %v276_v23 = vsel %vm245_vm15, %v215_v28, -inf  ;;  %v277_v24 = vsel %vm245_vm15, %v219_v36, -inf  ;;  %v170_v4 = vld [vmem:[%s501_s9 + $0x7c] sm:$0xf] }
  0x4b   : > { %v252_v21 = vmax.f32 %v250_v14, %v251_v10  ;;  %v265_v22 = vmax.f32 %v263_v15, %v264_v16  ;;  %v257_v25 = vsel %vm245_vm15, %v237_v7, -inf  ;;  %v268_v26 = vsel %vm245_vm15, %v230_v55, -inf }
  0x4c   : > { %v278_v27 = vmax.f32 %v276_v23, %v277_v24  ;;  %v279_v30 = vsel %vm245_vm15, %v223_v41, -inf  ;;  %v270_v33 = vsel %vm245_vm15, %v234_v60, -inf  ;;  %v281_v34 = vsel %vm245_vm15, %v227_v50, -inf }
  0x4d   : > { %v254_v31 = vmax.f32 %v252_v21, %v253_v18  ;;  %v267_v32 = vmax.f32 %v265_v22, %v266_v20  ;;  %v283_v38 = vsel %vm245_vm15, %v231_v56, -inf  ;;  %v291_v28 = vsel %vm245_vm15, %v216_v29, -inf }
  0x4e   : > { %v280_v35 = vmax.f32 %v278_v27, %v279_v30  ;;  %v292_v36 = vsel %vm245_vm15, %v220_v37, -inf  ;;  %v294_v43 = vsel %vm245_vm15, %v224_v46, -inf  ;;  %v259_v44 = vsel %vm245_vm15, %v241_v13, -inf }
  0x4f   : > { %v256_v40 = vmax.f32 %v254_v31, %v255_v19  ;;  %v269_v41 = vmax.f32 %v267_v32, %v268_v26  ;;  %v293_v42 = vmax.f32 %v291_v28, %v292_v36  ;;  %v272_v45 = vsel %vm245_vm15, %v238_v0, -inf }
  0x50   : > { %v282_v47 = vmax.f32 %v280_v35, %v281_v34  ;;  %v296_v48 = vsel %vm245_vm15, %v228_v51, -inf  ;;  %v285_v29 = vsel %vm245_vm15, %v235_v61, -inf  ;;  %v243_v37 = vsel %vm715_vm8, %v169_v39, -1e+30 }
  0x51   : > { %v258_v49 = vmax.f32 %v256_v40, %v257_v25  ;;  %v271_v6 = vmax.f32 %v269_v41, %v270_v33  ;;  %v295_v50 = vmax.f32 %v293_v42, %v294_v43  ;;  %v274_v52 = vsel %vm245_vm15, %v242_v17, -inf }
  0x52   : > { %v284_v53 = vmax.f32 %v282_v47, %v283_v38  ;;  %v298_v46 = vsel %vm245_vm15, %v232_v57, -inf  ;;  %v287_v56 = vsel %vm245_vm15, %v239_v1, -inf  ;;  %v244_v51 = vsel %vm715_vm8, %v170_v4, -1e+30 }
  0x53   : > { %v260_v54 = vmax.f32 %v258_v49, %v259_v44  ;;  %v273_v55 = vmax.f32 %v271_v6, %v272_v45  ;;  %v297_v58 = vmax.f32 %v295_v50, %v296_v48  ;;  %v300_v60 = vsel %vm245_vm15, %v236_v63, -inf }
  0x54   : > { %v286_v59 = vmax.f32 %v284_v53, %v285_v29  ;;  %v289_v2 = vsel %vm245_vm15, %v243_v37, -inf  ;;  %v302_v7 = vsel %vm245_vm15, %v240_v9, -inf  ;;  %v304_v62 = vsel %vm245_vm15, %v244_v51, -inf }
  0x55   : > { %v275_v61 = vmax.f32 %v273_v55, %v274_v52  ;;  %v299_v3 = vmax.f32 %v297_v58, %v298_v46  ;;  %vm306_vm9 = vcmp.le.f32.partialorder %v260_v54, -1e+29 }
  0x56   : > { %v288_v5 = vmax.f32 %v286_v59, %v287_v56  ;;  %v310_v57 = vsel %vm306_vm9, 0.0, %v260_v54 }
  0x57   : > { %v301_v0 = vmax.f32 %v299_v3, %v300_v60  ;;  %vm307_vm10 = vcmp.le.f32.partialorder %v275_v61, -1e+29  ;;  %v314_v1 = vsel %vm245_vm15, %v310_v57, 0.0 }
  0x58   : > { %v290_v8 = vmax.f32 %v288_v5, %v289_v2  ;;  %v311_v10 = vsel %vm307_vm10, 0.0, %v275_v61 }
  0x59   : > { %v303_v11 = vmax.f32 %v301_v0, %v302_v7  ;;  %v315_v63 = vsel %vm245_vm15, %v311_v10, 0.0 }
  0x5a   : > { %vm308_vm11 = vcmp.le.f32.partialorder %v290_v8, -1e+29  ;;  %v316_v12 = vadd.f32 %v315_v63, %v314_v1 }
  0x5b   : > { %v305_v13 = vmax.f32 %v303_v11, %v304_v62  ;;  %v312_v14 = vsel %vm308_vm11, 0.0, %v290_v8 }
  0x5c   : > { %v317_v9 = vsel %vm245_vm15, %v312_v14, 0.0 }
  0x5d   : > { %vm309_vm12 = vcmp.le.f32.partialorder %v305_v13, -1e+29  ;;  %v318_v15 = vadd.f32 %v317_v9, %v316_v12 }
  0x5e   : > { %v313_v16 = vsel %vm309_vm12, 0.0, %v305_v13 }
  0x5f   : > { %v319_v17 = vsel %vm245_vm15, %v313_v16, 0.0 }
  0x60   : > { %v320_v18 = vadd.f32 %v319_v17, %v318_v15 }
  0x62   : > { %v321_v19 = vrot.slane %v320_v18, 4 }
  0x64   : > { %v322_v20 = vadd.f32 %v321_v19, %v320_v18 }
  0x66   : > { %v323_v21 = vrot.slane %v322_v20, 2 }
  0x68   : > { %v324_v22 = vadd.f32 %v323_v21, %v322_v20 }
  0x6a   : > { %v325_v23 = vrot.slane %v324_v22, 1 }
  0x6c   : > { %v326_v24 = vadd.f32 %v325_v23, %v324_v22 }
  0x6e   : > { %v328_v25 = vmul.f32 0.0625, %v326_v24 }
  0x70   : > { %329 = vst [vmem:[%s136_s12] sm:$0x1] %v328_v25 }
  0x71 PF: > { %s28_s28 = sadd.s32 1, %s442_s28  }
  0x72   : > { %p25_p6 = scmp.ge.s32.totalorder %s28_s28, 10  }
  0x74   :  { %27 = sbr.rel (!%p25_p6) target bundleno = 36 (0x24), region = 54 }

// kernel: tdcnn_forward.7
= control target key start
LH: loop header
LB: loop body
LE: loop exit
PB: predicated region body
PF: predicated region fallthrough
CT: control target
= control target key end

     0   :  { %vm95_vm0 = vcmask 1040384   ;;  %vm226_vm1 = vcmask 1041409   ;;  %vm228_vm2 = vcmask 1042434   ;;  %vm230_vm3 = vcmask 1043459   ;;  %s1633_s0 = inlined_call_operand.vmem [shape: f32[8,128], index: 0, kind: input, shape index: {}]   ;;  %s1634_s1 = inlined_call_operand.vmem [shape: f32[8,49,128], index: 1, kind: input, shape index: {}]   ;;  %s1635_s2 = inlined_call_operand.vmem [shape: bf16[256,128], index: 2, kind: input, shape index: {}]   ;;  %s1636_s3 = inlined_call_operand.vmem [shape: f32[1,128], index: 3, kind: input, shape index: {}]   ;;  %s1637_s4 = inlined_call_operand.vmem [shape: f32[128,3], index: 4, kind: input, shape index: {}]   ;;  %s1638_s5 = inlined_call_operand.vmem [shape: f32[1,3], index: 5, kind: input, shape index: {}]   ;;  %s1639_s6 = inlined_call_operand.vmem [shape: f32[128,6], index: 6, kind: input, shape index: {}]   ;;  %s1640_s7 = inlined_call_operand.vmem [shape: f32[1,6], index: 7, kind: input, shape index: {}]   ;;  %s1641_s8 = inlined_call_operand.vmem [shape: f32[8,3], index: 8, kind: output, shape index: {0}]   ;;  %s1642_s9 = inlined_call_operand.hbm [shape: f32[8,6], index: 9, kind: output, shape index: {1}]  }
   0x1   :  { %v34_v0 = vld [vmem:[%s1634_s1] sm:$0xff]  ;;  %v35_v1 = vld [vmem:[%s1634_s1 + $0x8] sm:$0xff]  ;;  %v36_v2 = vld [vmem:[%s1634_s1 + $0x10] sm:$0xff]  ;;  %vm232_vm4 = vcmask 1044484  }
   0x2   :  { %v90_v3 = vadd.f32 %v35_v1, %v34_v0  ;;  %v37_v4 = vld [vmem:[%s1634_s1 + $0x18] sm:$0xff]  ;;  %v42_v6 = vld [vmem:[%s1634_s1 + $0x40] sm:$0xff]  ;;  %v43_v8 = vld [vmem:[%s1634_s1 + $0x48] sm:$0xff] }
   0x3   :  { %v41_v5 = vld [vmem:[%s1634_s1 + $0x38] sm:$0xff]  ;;  %v38_v7 = vld [vmem:[%s1634_s1 + $0x20] sm:$0xff]  ;;  %v39_v11 = vld [vmem:[%s1634_s1 + $0x28] sm:$0xff] }
   0x4   :  { %v91_v9 = vadd.f32 %v90_v3, %v36_v2  ;;  %v104_v10 = vadd.f32 %v42_v6, %v41_v5  ;;  %v44_v12 = vld [vmem:[%s1634_s1 + $0x50] sm:$0xff]  ;;  %v49_v15 = vld [vmem:[%s1634_s1 + $0x78] sm:$0xff]  ;;  %v50_v16 = vld [vmem:[%s1634_s1 + $0x80] sm:$0xff] }
   0x5   :  { %v48_v13 = vld [vmem:[%s1634_s1 + $0x70] sm:$0xff]  ;;  %v45_v19 = vld [vmem:[%s1634_s1 + $0x58] sm:$0xff]  ;;  %v47_v20 = vld [vmem:[%s1634_s1 + $0x68] sm:$0x1] }
   0x6   :  { %v40_v14 = vld [vmem:[%s1634_s1 + $0x30] sm:$0x1]  ;;  %v92_v17 = vadd.f32 %v91_v9, %v37_v4  ;;  %v105_v18 = vadd.f32 %v104_v10, %v43_v8  ;;  %v51_v21 = vld [vmem:[%s1634_s1 + $0x88] sm:$0xff]  ;;  %v117_v22 = vadd.f32 %v49_v15, %v48_v13  ;;  %v57_v25 = vld [vmem:[%s1634_s1 + $0xb8] sm:$0xff]  ;;  %v109_v43 = vsel %vm95_vm0, %v47_v20, 0.0 }
   0x7   :  { %v55_v23 = vld [vmem:[%s1634_s1 + $0xa8] sm:$0xff]  ;;  %v56_v24 = vld [vmem:[%s1634_s1 + $0xb0] sm:$0xff]  ;;  %v46_v28 = vld [vmem:[%s1634_s1 + $0x60] sm:$0xff]  ;;  %v96_v31 = vsel %vm95_vm0, %v40_v14, 0.0 }
   0x8   :  { %v93_v26 = vadd.f32 %v92_v17, %v38_v7  ;;  %v106_v27 = vadd.f32 %v105_v18, %v44_v12  ;;  %v52_v29 = vld [vmem:[%s1634_s1 + $0x90] sm:$0xff]  ;;  %v54_v30 = vld [vmem:[%s1634_s1 + $0xa0] sm:$0x1]  ;;  %v118_v32 = vadd.f32 %v117_v22, %v50_v16  ;;  %v130_v33 = vadd.f32 %v56_v24, %v55_v23  ;;  %v53_v34 = vld [vmem:[%s1634_s1 + $0x98] sm:$0xff] }
   0x9   :  { %v58_v35 = vld [vmem:[%s1634_s1 + $0xc0] sm:$0xff]  ;;  %v63_v37 = vld [vmem:[%s1634_s1 + $0xe8] sm:$0xff]  ;;  %v61_v41 = vld [vmem:[%s1634_s1 + $0xd8] sm:$0x1]  ;;  %v122_v56 = vsel %vm95_vm0, %v54_v30, 0.0 }
   0xa   :  { %v62_v36 = vld [vmem:[%s1634_s1 + $0xe0] sm:$0xff]  ;;  %v94_v38 = vadd.f32 %v93_v26, %v39_v11  ;;  %v107_v39 = vadd.f32 %v106_v27, %v45_v19  ;;  %v59_v40 = vld [vmem:[%s1634_s1 + $0xc8] sm:$0xff]  ;;  %v64_v42 = vld [vmem:[%s1634_s1 + $0xf0] sm:$0xff]  ;;  %v119_v44 = vadd.f32 %v118_v32, %v51_v21  ;;  %v131_v45 = vadd.f32 %v130_v33, %v57_v25 }
   0xb   :  { %v143_v46 = vadd.f32 %v63_v37, %v62_v36  ;;  %v65_v47 = vld [vmem:[%s1634_s1 + $0xf8] sm:$0xff]  ;;  %v68_v48 = vld [vmem:[%s1634_s1 + $0x110] sm:$0x1]  ;;  %v70_v53 = vld [vmem:[%s1634_s1 + $0x120] sm:$0xff]  ;;  %v135_v0 = vsel %vm95_vm0, %v61_v41, 0.0 }
   0xc   :  { %v69_v49 = vld [vmem:[%s1634_s1 + $0x118] sm:$0xff]  ;;  %v97_v50 = vadd.f32 %v96_v31, %v94_v38  ;;  %v108_v51 = vadd.f32 %v107_v39, %v46_v28  ;;  %v60_v52 = vld [vmem:[%s1634_s1 + $0xd0] sm:$0xff]  ;;  %v71_v54 = vld [vmem:[%s1634_s1 + $0x128] sm:$0xff]  ;;  %v120_v55 = vadd.f32 %v119_v44, %v52_v29  ;;  %v132_v57 = vadd.f32 %v131_v45, %v58_v35 }
   0xd   :  { %v144_v58 = vadd.f32 %v143_v46, %v64_v42  ;;  %v66_v59 = vld [vmem:[%s1634_s1 + $0x100] sm:$0xff]  ;;  %v72_v60 = vld [vmem:[%s1634_s1 + $0x130] sm:$0xff]  ;;  %v75_v61 = vld [vmem:[%s1634_s1 + $0x148] sm:$0x1]  ;;  %v156_v1 = vadd.f32 %v70_v53, %v69_v49  ;;  %v148_v8 = vsel %vm95_vm0, %v68_v48, 0.0 }
   0xe   :  { %v98_v62 = vrot.slane %v97_v50, 4  ;;  %v110_v63 = vadd.f32 %v109_v43, %v108_v51  ;;  %v76_v2 = vld [vmem:[%s1634_s1 + $0x150] sm:$0xff]  ;;  %v77_v3 = vld [vmem:[%s1634_s1 + $0x158] sm:$0xff]  ;;  %v78_v4 = vld [vmem:[%s1634_s1 + $0x160] sm:$0xff]  ;;  %v121_v5 = vadd.f32 %v120_v55, %v53_v34  ;;  %v133_v6 = vadd.f32 %v132_v57, %v59_v40 }
   0xf   :  { %v145_v7 = vadd.f32 %v144_v58, %v65_v47  ;;  %v67_v9 = vld [vmem:[%s1634_s1 + $0x108] sm:$0xff]  ;;  %v157_v12 = vadd.f32 %v156_v1, %v71_v54  ;;  %v169_v13 = vadd.f32 %v77_v3, %v76_v2  ;;  %v73_v14 = vld [vmem:[%s1634_s1 + $0x138] sm:$0xff]  ;;  %v82_v16 = vld [vmem:[%s1634_s1 + $0x180] sm:$0x1]  ;;  %v161_v20 = vsel %vm95_vm0, %v75_v61, 0.0 }
  0x10   :  { %v99_v10 = vadd.f32 %v98_v62, %v97_v50  ;;  %v111_v11 = vrot.slane %v110_v63, 4  ;;  %v79_v15 = vld [vmem:[%s1634_s1 + $0x168] sm:$0xff]  ;;  %v123_v17 = vadd.f32 %v122_v56, %v121_v5  ;;  %v134_v18 = vadd.f32 %v133_v6, %v60_v52  ;;  %v84_v22 = vld [vmem:[%s1634_s1 + $0x190] sm:$0xff]  ;;  %v74_v27 = vld [vmem:[%s1634_s1 + $0x140] sm:$0xff] }
  0x11   :  { %v146_v19 = vadd.f32 %v145_v7, %v66_v59  ;;  %v83_v21 = vld [vmem:[%s1634_s1 + $0x188] sm:$0xff]  ;;  %v158_v25 = vadd.f32 %v157_v12, %v72_v60  ;;  %v170_v26 = vadd.f32 %v169_v13, %v78_v4  ;;  %v80_v28 = vld [vmem:[%s1634_s1 + $0x170] sm:$0xff]  ;;  %v174_v32 = vsel %vm95_vm0, %v82_v16, 0.0  ;;  %v85_v33 = vld [vmem:[%s1634_s1 + $0x198] sm:$0xff] }
  0x12   :  { %v100_v23 = vrot.slane %v99_v10, 2  ;;  %v112_v24 = vadd.f32 %v111_v11, %v110_v63  ;;  %v124_v29 = vrot.slane %v123_v17, 4  ;;  %v136_v30 = vadd.f32 %v135_v0, %v134_v18  ;;  %v81_v38 = vld [vmem:[%s1634_s1 + $0x178] sm:$0xff]  ;;  %v86_v44 = vld [vmem:[%s1634_s1 + $0x1a0] sm:$0xff]  ;;  %v87_v53 = vld [vmem:[%s1634_s1 + $0x1a8] sm:$0xff] }
  0x13   :  { %v147_v31 = vadd.f32 %v146_v19, %v67_v9  ;;  %v159_v36 = vadd.f32 %v158_v25, %v73_v14  ;;  %v171_v37 = vadd.f32 %v170_v26, %v79_v15  ;;  %v89_v39 = vld [vmem:[%s1634_s1 + $0x1b8] sm:$0x1]  ;;  %v182_v43 = vadd.f32 %v84_v22, %v83_v21  ;;  %v88_v58 = vld [vmem:[%s1634_s1 + $0x1b0] sm:$0xff] }
  0x14   :  { %v101_v34 = vadd.f32 %v100_v23, %v99_v10  ;;  %v113_v35 = vrot.slane %v112_v24, 2  ;;  %v125_v40 = vadd.f32 %v124_v29, %v123_v17  ;;  %v137_v41 = vrot.slane %v136_v30, 4 }
  0x15   :  { %v149_v42 = vadd.f32 %v148_v8, %v147_v31  ;;  %v160_v47 = vadd.f32 %v159_v36, %v74_v27  ;;  %v172_v48 = vadd.f32 %v171_v37, %v80_v28  ;;  %v183_v52 = vadd.f32 %v182_v43, %v85_v33 }
  0x16   :  { %v102_v45 = vrot.slane %v101_v34, 1  ;;  %v114_v46 = vadd.f32 %v113_v35, %v112_v24  ;;  %v126_v49 = vrot.slane %v125_v40, 2  ;;  %v138_v50 = vadd.f32 %v137_v41, %v136_v30 }
  0x17   :  { %v150_v51 = vrot.slane %v149_v42, 4  ;;  %v162_v56 = vadd.f32 %v161_v20, %v160_v47  ;;  %v173_v57 = vadd.f32 %v172_v48, %v81_v38  ;;  %v184_v62 = vadd.f32 %v183_v52, %v86_v44 }
  0x18   :  { %v103_v54 = vadd.f32 %v102_v45, %v101_v34  ;;  %v115_v55 = vrot.slane %v114_v46, 1  ;;  %v127_v59 = vadd.f32 %v126_v49, %v125_v40  ;;  %v139_v60 = vrot.slane %v138_v50, 2 }
  0x19   :  { %v151_v61 = vadd.f32 %v150_v51, %v149_v42  ;;  %v163_v0 = vrot.slane %v162_v56, 4  ;;  %v175_v1 = vadd.f32 %v174_v32, %v173_v57  ;;  %v187_v2 = vsel %vm95_vm0, %v89_v39, 0.0 }
  0x1a   :  { %v116_v63 = vadd.f32 %v115_v55, %v114_v46  ;;  %v128_v3 = vrot.slane %v127_v59, 1  ;;  %v140_v4 = vadd.f32 %v139_v60, %v138_v50  ;;  %v185_v6 = vadd.f32 %v184_v62, %v87_v53 }
  0x1b   :  { %v152_v5 = vrot.slane %v151_v61, 2  ;;  %v164_v7 = vadd.f32 %v163_v0, %v162_v56  ;;  %v176_v8 = vrot.slane %v175_v1, 4  ;;  %v1354_v9 = vmul.f32 0.020408163, %v103_v54 }
  0x1c   :  { %v1356_v10 = vmul.f32 0.020408163, %v116_v63  ;;  %v129_v11 = vadd.f32 %v128_v3, %v127_v59  ;;  %v141_v12 = vrot.slane %v140_v4, 1  ;;  %v186_v14 = vadd.f32 %v185_v6, %v88_v58 }
  0x1d   :  { %v153_v13 = vadd.f32 %v152_v5, %v151_v61  ;;  %v165_v15 = vrot.slane %v164_v7, 2  ;;  %v177_v16 = vadd.f32 %v176_v8, %v175_v1  ;;  %v210_v17 = vmul.f32 %v1354_v9, %v1354_v9 }
  0x1e   :  { %v211_v18 = vmul.f32 %v1356_v10, %v1356_v10  ;;  %v142_v19 = vadd.f32 %v141_v12, %v140_v4  ;;  %v188_v21 = vadd.f32 %v187_v2, %v186_v14  ;;  %v1362_v22 = vmul.f32 0.020408163, %v129_v11 }
  0x1f   :  { %v154_v20 = vrot.slane %v153_v13, 1  ;;  %v166_v23 = vadd.f32 %v165_v15, %v164_v7  ;;  %v178_v24 = vrot.slane %v177_v16, 2 }
  0x20   :  { %v227_v25 = vsel %vm226_vm1, %v211_v18, %v210_v17  ;;  %v189_v27 = vrot.slane %v188_v21, 4  ;;  %v1365_v28 = vmul.f32 0.020408163, %v142_v19  ;;  %v212_v29 = vmul.f32 %v1362_v22, %v1362_v22 }
  0x21   :  { %v155_v26 = vadd.f32 %v154_v20, %v153_v13  ;;  %v167_v30 = vrot.slane %v166_v23, 1  ;;  %v179_v31 = vadd.f32 %v178_v24, %v177_v16 }
  0x22   :  { %v190_v32 = vadd.f32 %v189_v27, %v188_v21  ;;  %v213_v34 = vmul.f32 %v1365_v28, %v1365_v28  ;;  %v229_v35 = vsel %vm228_vm2, %v212_v29, %v227_v25 }
  0x23   :  { %v1369_v33 = vmul.f32 0.020408163, %v155_v26  ;;  %v168_v36 = vadd.f32 %v167_v30, %v166_v23  ;;  %v180_v37 = vrot.slane %v179_v31, 1 }
  0x24   :  { %v191_v38 = vrot.slane %v190_v32, 2  ;;  %v231_v40 = vsel %vm230_vm3, %v213_v34, %v229_v35 }
  0x25   :  { %v214_v39 = vmul.f32 %v1369_v33, %v1369_v33  ;;  %v181_v41 = vadd.f32 %v180_v37, %v179_v31  ;;  %v1377_v42 = vmul.f32 0.020408163, %v168_v36 }
  0x26   :  { %15 = vsyncpa [#allocation3], 0  ;;  %v192_v43 = vadd.f32 %v191_v38, %v190_v32  ;;  %vm234_vm5 = vcmask 1045509   ;;  %vm236_vm6 = vcmask 1046534   ;;  %vm238_vm7 = vcmask 1047559   ;;  %v1395_v54 = vld [vmem:[%s1633_s0] sm:$0xff] }
  0x27   :  { %v1379_v44 = vmul.f32 0.020408163, %v181_v41  ;;  %v215_v45 = vmul.f32 %v1377_v42, %v1377_v42  ;;  %v233_v46 = vsel %vm232_vm4, %v214_v39, %v231_v40  ;;  %v204_v56 = vmul.f32 %v1395_v54, %v1395_v54 }
  0x28   :  { %v193_v47 = vrot.slane %v192_v43, 1  ;;  %v1124_v57 = vmov 0.0   ;;  %vm1125_vm8 = vmmov 0   ;;  %vm362_vm9 = vcmask 64512  }
  0x29   :  { %v216_v48 = vmul.f32 %v1379_v44, %v1379_v44  ;;  %v235_v50 = vsel %vm234_vm5, %v215_v45, %v233_v46  ;;  %940 = vmatprep.subr.mxu0 %v1124_v57  ;;  %942 = vmatprep.mubr.msk.f32.mxu0 %vm1125_vm8, %v1124_v57  ;;  %v382_v45 = vsel %vm226_vm1, %v1356_v10, %v1354_v9  ;;  %vm734_vm10 = vcmask 23552  }
  0x2a   :  { %v194_v49 = vadd.f32 %v193_v47, %v192_v43  ;;  %v383_v46 = vsel %vm228_vm2, %v1362_v22, %v382_v45  ;;  %v757_v45 = vld [vmem:[%s1639_s6 + $0x50] sm:$0xff]  ;;  %vm840_vm11 = vcmask 48128  }
  0x2b   :  { %v237_v52 = vsel %vm236_vm6, %v216_v48, %v235_v50  ;;  %v384_v47 = vsel %vm230_vm3, %v1365_v28, %v383_v46  ;;  %v758_v46 = vld [vmem:[%s1639_s6 + $0x58] sm:$0xff] }
  0x2c   :  { %v1387_v51 = vmul.f32 0.020408163, %v194_v49  ;;  %v385_v48 = vsel %vm232_vm4, %v1369_v33, %v384_v47  ;;  %v1060_v47 = vpack.c.bf16 %v758_v46, %v757_v45 }
  0x2d   :  { %v386_v49 = vsel %vm234_vm5, %v1377_v42, %v385_v48  ;;  %v653_v48 = vld [vmem:[%s1637_s4 + $0x60] sm:$0xff] }
  0x2e   :  { %v217_v53 = vmul.f32 %v1387_v51, %v1387_v51  ;;  %v387_v50 = vsel %vm236_vm6, %v1379_v44, %v386_v49  ;;  %v654_v49 = vld [vmem:[%s1637_s4 + $0x68] sm:$0xff] }
  0x30   :  { %v239_v55 = vsel %vm238_vm7, %v217_v53, %v237_v52  ;;  %v388_v52 = vsel %vm238_vm7, %v1387_v51, %v387_v50  ;;  %v1080_v53 = vld [vmem:[%s1635_s2 + $0x60] sm:$0xff]  }
  0x31   :  { %241 = vadd.xlane.f32.xlu0 %v239_v55  ;;  %v1081_v55 = vld [vmem:[%s1635_s2 + $0x20] sm:$0xff]  }
  0x32   :  { %v759_v50 = vld [vmem:[%s1639_s6 + $0x60] sm:$0xff] }
  0x35   :  { %205 = vadd.xlane.f32.xlu0 %v204_v56  ;;  %v1082_v56 = vld [vmem:[%s1635_s2 + $0x68] sm:$0xff]  }
  0xbe   :  { %v242_v58 = vpop.xlane.xlu0 %241 }
  0xbf   :  { %v243_v59 = vadd.f32 1e-08, %v242_v58  ;;  %v1083_v58 = vld [vmem:[%s1635_s2 + $0x28] sm:$0xff]  }
  0xc1   :  { %1088 = vrsqrt.f32 %v243_v59  ;;  %v1084_v59 = vld [vmem:[%s1635_s2 + $0x70] sm:$0xff]  }
  0xc2   :  { %v206_v60 = vpop.xlane.xlu0 %205 }
  0xc3   :  { %v207_v61 = vadd.f32 1e-08, %v206_v60  ;;  %v1085_v60 = vld [vmem:[%s1635_s2 + $0x30] sm:$0xff]  }
  0xc5   :  { %1090 = vrsqrt.f32 %v207_v61 }
  0xcb   :  { %v1089_v62 = vpop.eup %1088 }
  0xcc   :  { %v246_v63 = vrot.slane %v1089_v62, 1  ;;  %v247_v0 = vrot.slane %v1089_v62, 2  ;;  %v248_v1 = vrot.slane %v1089_v62, 3  ;;  %v249_v2 = vrot.slane %v1089_v62, 4 }
  0xcd   :  { %v250_v3 = vrot.slane %v1089_v62, 5  ;;  %v251_v4 = vrot.slane %v1089_v62, 6  ;;  %v252_v5 = vrot.slane %v1089_v62, 7  ;;  %v261_v12 = vmul.f32 %v1089_v62, %v1354_v9  ;;  %v1072_v9 = vld [vmem:[%s1635_s2 + $0x40] sm:$0xff]  }
  0xce   :  { %v262_v6 = vmul.f32 %v246_v63, %v1356_v10  ;;  %v263_v7 = vmul.f32 %v247_v0, %v1362_v22  ;;  %v264_v8 = vmul.f32 %v248_v1, %v1365_v28  ;;  %v265_v11 = vmul.f32 %v249_v2, %v1369_v33  ;;  %v1073_v10 = vld [vmem:[%s1635_s2] sm:$0xff]   ;;  %v1074_v22 = vld [vmem:[%s1635_s2 + $0x48] sm:$0xff]   ;;  %884 = vmatprep.subr.bf16.mxu1 %v1072_v9  ;;  %v1076_v33 = vld [vmem:[%s1635_s2 + $0x50] sm:$0xff]  }
  0xcf   :  { %v266_v13 = vmul.f32 %v250_v3, %v1377_v42  ;;  %v267_v16 = vmul.f32 %v251_v4, %v1379_v44  ;;  %v268_v17 = vmul.f32 %v252_v5, %v1387_v51  ;;  %v1091_v25 = vpop.eup %1090  ;;  %885 = vmatpush3.bf16.msra.mxu1 %v1073_v10  ;;  %v1075_v28 = vld [vmem:[%s1635_s2 + $0x8] sm:$0xff]   ;;  %v1077_v42 = vld [vmem:[%s1635_s2 + $0x10] sm:$0xff]   ;;  %v1078_v44 = vld [vmem:[%s1635_s2 + $0x58] sm:$0xff]   ;;  %v1126_v4 = vmov 0.0|0.0  }
  0xd0   :  { %v277_v14 = vrot.slane %v262_v6, 7  ;;  %v279_v15 = vrot.slane %v263_v7, 6  ;;  %v281_v19 = vrot.slane %v264_v8, 5  ;;  %v283_v21 = vrot.slane %v265_v11, 4  ;;  %886 = vmatprep.subr.bf16.mxu1 %v1074_v22  ;;  %v1079_v51 = vld [vmem:[%s1635_s2 + $0x18] sm:$0xff]   ;;  %v641_v2 = vld [vmem:[%s1637_s4] sm:$0xff] }
  0xd1   :  { %v285_v24 = vrot.slane %v266_v13, 3  ;;  %v287_v27 = vrot.slane %v267_v16, 2  ;;  %v289_v30 = vrot.slane %v268_v17, 1  ;;  %v209_v34 = vmul.f32 %v1091_v25, %v1395_v54  ;;  %v1086_v0 = vld [vmem:[%s1635_s2 + $0x78] sm:$0xff]   ;;  %v642_v3 = vld [vmem:[%s1637_s4 + $0x8] sm:$0xff]  ;;  %v643_v6 = vld [vmem:[%s1637_s4 + $0x10] sm:$0xff] }
  0xd2   :  { %v278_v18 = vsel %vm226_vm1, %v277_v14, %v261_v12  ;;  %v1087_v1 = vld [vmem:[%s1635_s2 + $0x38] sm:$0xff]   ;;  %v1021_v5 = vpack.c.bf16 %v642_v3, %v641_v2  ;;  %v645_v11 = vld [vmem:[%s1637_s4 + $0x20] sm:$0xff]  ;;  %v646_v12 = vld [vmem:[%s1637_s4 + $0x28] sm:$0xff] }
  0xd3   :  { %v280_v20 = vsel %vm228_vm2, %v279_v15, %v278_v18  ;;  %887 = vmatpush3.bf16.msra.mxu1 %v1075_v28  ;;  %v644_v7 = vld [vmem:[%s1637_s4 + $0x18] sm:$0xff]  ;;  %v1027_v13 = vpack.c.bf16 %v646_v12, %v645_v11  ;;  %v647_v14 = vld [vmem:[%s1637_s4 + $0x30] sm:$0xff]  ;;  %v649_v17 = vld [vmem:[%s1637_s4 + $0x40] sm:$0xff] }
  0xd4   :  { %v282_v23 = vsel %vm230_vm3, %v281_v19, %v280_v20  ;;  %888 = vmatprep.subr.bf16.mxu1 %v1076_v33  ;;  %v1024_v8 = vpack.c.bf16 %v644_v7, %v643_v6  ;;  %v648_v15 = vld [vmem:[%s1637_s4 + $0x38] sm:$0xff]  ;;  %v650_v18 = vld [vmem:[%s1637_s4 + $0x48] sm:$0xff]  ;;  %v651_v20 = vld [vmem:[%s1637_s4 + $0x50] sm:$0xff] }
  0xd5   :  { %v284_v26 = vsel %vm232_vm4, %v283_v21, %v282_v23  ;;  %v1030_v16 = vpack.c.bf16 %v648_v15, %v647_v14  ;;  %v1033_v19 = vpack.c.bf16 %v650_v18, %v649_v17  ;;  %v652_v21 = vld [vmem:[%s1637_s4 + $0x58] sm:$0xff]  ;;  %v748_v25 = vld [vmem:[%s1639_s6 + $0x8] sm:$0xff]  ;;  %v655_v22 = vld [vmem:[%s1637_s4 + $0x70] sm:$0xff] }
  0xd6   :  { %v286_v29 = vsel %vm234_vm5, %v285_v24, %v284_v26  ;;  %v1036_v23 = vpack.c.bf16 %v652_v21, %v651_v20  ;;  %v747_v24 = vld [vmem:[%s1639_s6] sm:$0xff]  ;;  %v760_v9 = vld [vmem:[%s1639_s6 + $0x68] sm:$0xff]  ;;  %v656_v28 = vld [vmem:[%s1637_s4 + $0x78] sm:$0xff] }
  0xd7   :  { %v288_v31 = vsel %vm236_vm6, %v287_v27, %v286_v29  ;;  %889 = vmatpush3.bf16.msra.mxu1 %v1077_v42  ;;  %v463_v27 = vpack.c.bf16 %v1395_v54, %v1395_v54  ;;  %v751_v54 = vld [vmem:[%s1639_s6 + $0x20] sm:$0xff]  ;;  %v1063_v10 = vpack.c.bf16 %v760_v9, %v759_v50  ;;  %v761_v33 = vld [vmem:[%s1639_s6 + $0x70] sm:$0xff]  ;;  %v1042_v42 = vpack.c.bf16 %v656_v28, %v655_v22 }
  0xd8   :  { %v290_v32 = vsel %vm238_vm7, %v289_v30, %v288_v31  ;;  %890 = vmatprep.subr.bf16.mxu1 %v1078_v44  ;;  %v1045_v31 = vpack.c.bf16 %v748_v25, %v747_v24  ;;  %v762_v44 = vld [vmem:[%s1639_s6 + $0x78] sm:$0xff] }
  0xd9   :  { %941 = vmatpush3.xpose.msra.mxu0 %v290_v32  ;;  %v749_v32 = vld [vmem:[%s1639_s6 + $0x10] sm:$0xff] }
  0xda   :  { %945 = vmatprep.subr.mxu0 %v1124_v57 }
  0xdb   :  { %891 = vmatpush3.bf16.msra.mxu1 %v1079_v51  ;;  %v1066_v51 = vpack.c.bf16 %v762_v44, %v761_v33 }
  0xdc   :  { %943 = vmatmul.mubr.f32.vlgmr.msra.gmra.mrb[0].mxu0 %v209_v34  ;;  %892 = vmatprep.subr.bf16.mxu1 %v1080_v53  ;;  %v750_v34 = vld [vmem:[%s1639_s6 + $0x18] sm:$0xff] }
  0xdd   :  { %947 = vmatprep.mubr.msk.f32.mxu0 %vm1125_vm8, %v1124_v57  ;;  %946 = vmatpush3.msra.mxu0 %v388_v52  ;;  %v1039_v52 = vpack.c.bf16 %v654_v49, %v653_v48 }
  0xde   :  { %1020 = vmatprep.subr.bf16.mxu0 %v1126_v4 }
  0xdf   :  { %893 = vmatpush3.bf16.msra.mxu1 %v1081_v55  ;;  %v861_v55 = vld [vmem:[%s1636_s3] ss:$0 sm:$0xff]  ;;  %s1127_s3 = smov [#allocation2]  }
  0xe0   :  { %894 = vmatprep.subr.bf16.mxu1 %v1082_v56 }
  0xe3   :  { %895 = vmatpush3.bf16.msra.mxu1 %v1083_v58 }
  0xe4   :  { %896 = vmatprep.subr.bf16.mxu1 %v1084_v59 }
  0xe7   :  { %897 = vmatpush3.bf16.msra.mxu1 %v1085_v60 }
  0xe8   :  { %898 = vmatprep.subr.bf16.mxu1 %v1086_v0  ;;  %v879_v0 = vld [vmem:[%s1640_s7] ss:$0 sm:$0xff] }
  0xeb   :  { %899 = vmatpush3.bf16.msra.mxu1 %v1087_v1 }
  0xec   :  { %1044 = vmatprep.subr.bf16.mxu1 %v1126_v4 }
 0x1af   :  { %v358_v35 = vpop.f32.mrb[0].mxu0 }
 0x1b0   :  { %v944_v36 = vpop.f32.mrb[1].mxu0  ;;  %v363_v37 = vsel %vm362_vm9, %v358_v35, -inf }
 0x1b1   :  { %364 = vmax.xlane.f32.xlu1 %v363_v37  ;;  %v752_v36 = vld [vmem:[%s1639_s6 + $0x28] sm:$0xff] }
 0x1b2   :  { %v1051_v37 = vpack.c.bf16 %v752_v36, %v751_v54 }
 0x23e   :  { %v365_v38 = vpop.xlane.xlu1 %364 }
 0x23f   :  { %v366_v39 = vsub.f32 %v358_v35, %v365_v38  ;;  %v1048_v35 = vpack.c.bf16 %v750_v34, %v749_v32  ;;  %v753_v38 = vld [vmem:[%s1639_s6 + $0x30] sm:$0xff] }
 0x241   :  { %v367_v40 = vmul.f32 1.442695, %v366_v39 }
 0x243   :  { %1092 = vpow2.f32 %v367_v40  ;;  %v755_v40 = vld [vmem:[%s1639_s6 + $0x40] sm:$0xff] }
 0x24d   :  { %v1093_v41 = vpop.eup %1092 }
 0x24e   :  { %v369_v43 = vsel %vm362_vm9, %v1093_v41, 0.0 }
 0x24f   :  { %370 = vadd.xlane.f32.xlu1 %v369_v43 }
 0x2dc   :  { %v371_v61 = vpop.xlane.xlu1 %370 }
 0x2dd   :  { %1094 = vrcp.f32 %v371_v61 }
 0x2e7   :  { %v1095_v62 = vpop.eup %1094 }
 0x2e8   :  { %v373_v63 = vmul.f32 %v1095_v62, %v1093_v41  ;;  %v756_v41 = vld [vmem:[%s1639_s6 + $0x48] sm:$0xff] }
 0x2e9   :  { %v1057_v43 = vpack.c.bf16 %v756_v41, %v755_v40 }
 0x2ea   :  { %948 = vmatmul.mubr.msk.f32.vlgmr.msra.gmra.mrb[2].mxu0 %vm362_vm9, %v373_v63  ;;  %v878_v63 = vld [vmem:[%s1638_s5] ss:$0 sm:$0xff]  ;;  %s850_s5 = sshll.u32 %s1127_s3, 4  ;;  %s851_s5 = int_to_ptr.vmem [resolvable:$true] %s850_s5 }
 0x2eb   :  { %982 = vmatprep.mubr.msk.f32.mxu0 %vm1125_vm8, %v1124_v57  ;;  %1022 = vmatpush3.bf16.msra.mxu0 %v1021_v5  ;;  %s1100_s7 = scalar_lea.vmem %s851_s5, 128  ;;  %p1105_p1 = scmp.lt.s32.totalorder %s851_s5, %s851_s5 }
 0x2ec   :  { %1023 = vmatprep.subr.bf16.mxu0 %v1126_v4  ;;  %p1101_p0 = scmp.ne.s32.totalorder %s851_s5, %s1100_s7  ;;  %p1106_p2 = scmp.lt.s32.totalorder %s1100_s7, %s1100_s7 }
 0x2ee   :  { %p1107_p3 = por %p1106_p2, %p1105_p1 }
 0x2ef   :  { %1025 = vmatpush3.bf16.msra.mxu0 %v1024_v8 }
 0x2f0   :  { %1026 = vmatprep.subr.bf16.mxu0 %v1126_v4  ;;  %p1108_p4 = pnand %p1107_p3, %p1101_p0 }
 0x2f3   :  { %1028 = vmatpush3.bf16.msra.mxu0 %v1027_v13 }
 0x2f4   :  { %1029 = vmatprep.subr.bf16.mxu0 %v1126_v4 }
 0x2f7   :  { %1031 = vmatpush3.bf16.msra.mxu0 %v1030_v16 }
 0x2f8   :  { %1032 = vmatprep.subr.bf16.mxu0 %v1126_v4 }
 0x2fb   :  { %1034 = vmatpush3.bf16.msra.mxu0 %v1033_v19 }
 0x2fc   :  { %1035 = vmatprep.subr.bf16.mxu0 %v1126_v4 }
 0x2ff   :  { %1037 = vmatpush3.bf16.msra.mxu0 %v1036_v23 }
 0x300   :  { %1038 = vmatprep.subr.bf16.mxu0 %v1126_v4 }
 0x303   :  { %1040 = vmatpush3.bf16.msra.mxu0 %v1039_v52 }
 0x304   :  { %1041 = vmatprep.subr.bf16.mxu0 %v1126_v4 }
 0x307   :  { %1043 = vmatpush3.bf16.msra.mxu0 %v1042_v42 }
 0x3bd   :  { %v459_v26 = vpop.f32.mrb[2].mxu0 }
 0x3be   :  { %v949_v29 = vpop.f32.mrb[3].mxu0  ;;  %v464_v30 = vpack.c.bf16 %v459_v26, %v459_v26 }
 0x3c0   :  { %632 = vmatprep.mubr.bf16.mxu1 %v464_v30 }
 0x3c1   :  { %633 = vmatmul.mubr.bf16.vlgmr.msra.gmra.mrb[0].mxu1 %v463_v27 }
 0x3c2   :  { %1046 = vmatpush3.bf16.msra.mxu1 %v1045_v31  ;;  %1017 = vmatprep.mubr.msk.f32.mxu1 %vm1125_vm8, %v1124_v57  ;;  %v754_v57 = vld [vmem:[%s1639_s6 + $0x38] sm:$0xff] }
 0x3c3   :  { %1047 = vmatprep.subr.bf16.mxu1 %v1126_v4  ;;  %v1054_v39 = vpack.c.bf16 %v754_v57, %v753_v38 }
 0x3c6   :  { %1049 = vmatpush3.bf16.msra.mxu1 %v1048_v35 }
 0x3c7   :  { %1050 = vmatprep.subr.bf16.mxu1 %v1126_v4 }
 0x3ca   :  { %1052 = vmatpush3.bf16.msra.mxu1 %v1051_v37 }
 0x3cb   :  { %1053 = vmatprep.subr.bf16.mxu1 %v1126_v4 }
 0x3ce   :  { %1055 = vmatpush3.bf16.msra.mxu1 %v1054_v39 }
 0x3cf   :  { %1056 = vmatprep.subr.bf16.mxu1 %v1126_v4 }
 0x3d2   :  { %1058 = vmatpush3.bf16.msra.mxu1 %v1057_v43 }
 0x3d3   :  { %1059 = vmatprep.subr.bf16.mxu1 %v1126_v4 }
 0x3d6   :  { %1061 = vmatpush3.bf16.msra.mxu1 %v1060_v47 }
 0x3d7   :  { %1062 = vmatprep.subr.bf16.mxu1 %v1126_v4 }
 0x3da   :  { %1064 = vmatpush3.bf16.msra.mxu1 %v1063_v10 }
 0x3db   :  { %1065 = vmatprep.subr.bf16.mxu1 %v1126_v4 }
 0x3de   :  { %1067 = vmatpush3.bf16.msra.mxu1 %v1066_v51 }
 0x494   :  { %v900_v53 = vpop.f32.mrb[0].mxu1 }
 0x495   :  { %v901_v56 = vpop.f32.mrb[1].mxu1 }
 0x496   :  { %v902_v58 = vadd.f32 %v901_v56, %v900_v53  ;;  %v903_v59 = vpop.f32.mrb[2].mxu1 }
 0x497   :  { %v904_v60 = vpop.f32.mrb[3].mxu1 }
 0x498   :  { %v635_v61 = vadd.f32 %v902_v58, %v861_v55 }
 0x49a   :  { %v640_v62 = vmax.f32 %v635_v61, 0.0 }
 0x49c   :  { %983 = vmatmul.mubr.f32.vlgmr.msra.gmra.mrb[4].mxu0 %v640_v62  ;;  %1018 = vmatmul.mubr.f32.vlgmr.msra.gmra.mrb[4].mxu1 %v640_v62 }
 0x56f   :  { %v730_v1 = vpop.f32.mrb[4].mxu0  ;;  %v836_v2 = vpop.f32.mrb[4].mxu1 }
 0x570   :  { %v731_v3 = vadd.f32 %v878_v63, %v730_v1  ;;  %v837_v4 = vadd.f32 %v879_v0, %v836_v2  ;;  %v984_v5 = vpop.f32.mrb[5].mxu0  ;;  %v1019_v6 = vpop.f32.mrb[5].mxu1 }
 0x572   :  { %v735_v7 = vsel %vm734_vm10, %v731_v3, -inf  ;;  %841 = vst.msk [vmem:[#allocation2] sm:$0xff] %vm840_vm11, %v837_v4 }
 0x573   :  { %736 = vmax.xlane.f32.xlu0 %v735_v7 }
 0x600   :  { %v737_v8 = vpop.xlane.xlu0 %736 }
 0x601   :  { %v738_v11 = vsub.f32 %v731_v3, %v737_v8 }
 0x603   :  { %v739_v12 = vmul.f32 1.442695, %v738_v11 }
 0x605   :  { %1096 = vpow2.f32 %v739_v12 }
 0x60f   :  { %v1097_v13 = vpop.eup %1096 }
 0x610   :  { %v741_v14 = vsel %vm734_vm10, %v1097_v13, 0.0 }
 0x611   :  { %742 = vadd.xlane.f32.xlu1 %v741_v14 }
 0x612   :  { %1111 = shalt.err (!%p1108_p4)
}
 0x613   :  { %s1112_s23 = scalar_lea.hbm %s1642_s9, 128 }
 0x614   :  { %p1113_p5 = scmp.ne.s32.totalorder %s1642_s9, %s1112_s23  ;;  %p1116_p6 = scmp.lt.u32.totalorder %s1112_s23, %s1642_s9 }
 0x616   :  { %p1118_p7 = pnand %p1116_p6, %p1113_p5 }
 0x618   :  { %1121 = shalt.err (!%p1118_p7)
}
 0x619   :  { %853 = dma.vmem_to_hbm [thread:$0]  %s851_s5, 128, %s1642_s9, [#allocation3]  }
 0x69e   :  { %v743_v15 = vpop.xlane.xlu1 %742 }
 0x69f   :  { %1098 = vrcp.f32 %v743_v15 }
 0x6a9   :  { %v1099_v16 = vpop.eup %1098 }
 0x6aa   :  { %v745_v17 = vmul.f32 %v1099_v16, %v1097_v13 }
 0x6ac   :  { %746 = vst.msk [vmem:[%s1641_s8] sm:$0xff] %vm734_vm10, %v745_v17 }
 0x6ad   :  { %1122 = dma.done.wait [#allocation3], 128  }
 0x6ae   :  { %1123 = vsyncadd [#allocation3], 4294967168 }
 0x6af   :  { %859 = vsyncpa [#allocation3], 1 }

</bundles_post_ra>
